<compile_context>
chip_gen: v6e
topology: v6e:2x2x1
jax: 0.10.0
libtpu: 0.0.40
codegen_flags: <defaults>
</compile_context>

<pallas_src>
import functools

import jax
import jax.numpy as jnp
from jax.experimental import pallas as pl
from jax.experimental.pallas import tpu as pltpu


def atnet_kernel(x_ref, bits_ref, wih_ref, whh_ref, b_ref,
                 wd_ref, bd_ref, wo_ref, bo_ref,
                 pred_ref,
                 gx_scr, h_scr, c_scr, maxh_scr,
                 *, dropout_p):
    T, B, E = x_ref.shape
    H = h_scr.shape[1]

    # ---- dropout (F.dropout training semantics: zero w.p. p, scale 1/(1-p)) ----
    # Integer threshold on uniform int32 bits (no u32->f32 convert needed).
    thr = jnp.int32(min(2 ** 31 - 1, int(round(dropout_p * 2.0 ** 32)) - 2 ** 31))
    keep = (bits_ref[...] >= thr).astype(jnp.float32)
    scale = jnp.float32(1.0 / (1.0 - dropout_p)) if dropout_p > 0.0 else jnp.float32(1.0)
    xdrop = x_ref[...] * keep * scale                                    # (T, B, E) f32

    # ---- hoisted input projection: one big MXU matmul + bias (done once) ----
    gx = jnp.dot(xdrop.reshape(T * B, E).astype(jnp.bfloat16), wih_ref[...],
                 preferred_element_type=jnp.float32)                     # (T*B, 4H)
    gx_scr[...] = (gx + b_ref[...]).reshape(T, B, 4 * H)

    # ---- single-layer LSTM recurrence: only h @ W_hh on the serial path ----
    h_scr[...] = jnp.zeros_like(h_scr)
    c_scr[...] = jnp.zeros_like(c_scr)
    maxh_scr[...] = jnp.full_like(maxh_scr, -jnp.inf)

    def step(t, carry):
        gates = gx_scr[t] + jnp.dot(h_scr[...].astype(jnp.bfloat16), whh_ref[...],
                                    preferred_element_type=jnp.float32)  # (B, 4H)
        # Gate layout pre-reordered to [i, f, o, g] (see prepare_params):
        # one sigmoid over a contiguous 3H slab, one tanh over the last H.
        sig = jax.nn.sigmoid(gates[:, 0:3 * H])
        i_g = sig[:, 0:H]
        f_g = sig[:, H:2 * H]
        o_g = sig[:, 2 * H:3 * H]
        g_g = jnp.tanh(gates[:, 3 * H:4 * H])
        c_new = f_g * c_scr[...] + i_g * g_g
        h_new = o_g * jnp.tanh(c_new)
        c_scr[...] = c_new
        h_scr[...] = h_new
        # max_pool1d over the full time axis, computed online.
        maxh_scr[...] = jnp.maximum(maxh_scr[...], h_new)
        return carry

    jax.lax.fori_loop(0, T, step, 0, unroll=True)

    # ---- dense + relu, out + sigmoid (lane-dense padded widths) ----
    dense = jnp.maximum(
        jnp.dot(maxh_scr[...].astype(jnp.bfloat16), wd_ref[...],
                preferred_element_type=jnp.float32) + bd_ref[...], 0.0)
    logits = (jnp.dot(dense.astype(jnp.bfloat16), wo_ref[...],
                      preferred_element_type=jnp.float32) + bo_ref[...])
    pred_ref[...] = jax.nn.sigmoid(logits)


def _round_up(x, m):
    return ((x + m - 1) // m) * m


def init_params(key, vocab, emb_dim, lstm_units, dense_units):
    """Parameters in PyTorch layout (Linear: (out,in); LSTM gates stacked [i,f,g,o])."""
    ks = jax.random.split(key, 9)
    s = 0.1
    H = lstm_units

    def n(k, shape):
        return jax.random.normal(k, shape, jnp.float32) * s

    return {
        "emb":     n(ks[0], (vocab, emb_dim)),
        "w_ih":    n(ks[1], (4 * H, emb_dim)),     # PyTorch weight_ih_l0
        "w_hh":    n(ks[2], (4 * H, H)),           # PyTorch weight_hh_l0
        "b_ih":    n(ks[3], (4 * H,)),
        "b_hh":    n(ks[4], (4 * H,)),
        "w_dense": n(ks[5], (dense_units, H)),     # PyTorch Linear (out, in)
        "b_dense": n(ks[6], (dense_units,)),
        "w_out":   n(ks[7], (2, dense_units)),
        "b_out":   n(ks[8], (2,)),
    }


def prepare_params(params, *, dense_pad=128, out_pad=128):
    """Reorder/transpose/pad PyTorch-layout params for the kernel.

    - LSTM gate rows reordered [i,f,g,o] -> [i,f,o,g] (sigmoid slab + tanh slab).
    - b_lstm = b_ih + b_hh (PyTorch applies both).
    - Linear weights transposed to (in, out); dense/out widths zero-padded to
      lane-dense multiples of 128 (padding is sliced off in the wrapper).
    - Matmul weights cast to bf16; biases stay f32.
    """
    H = params["w_hh"].shape[1]
    D = params["w_dense"].shape[0]

    def reorder_gates(w):  # rows stacked [i, f, g, o] -> [i, f, o, g]
        i, f, g, o = jnp.split(w, 4, axis=0)
        return jnp.concatenate([i, f, o, g], axis=0)

    w_ih = reorder_gates(params["w_ih"]).T.astype(jnp.bfloat16)          # (E, 4H)
    w_hh = reorder_gates(params["w_hh"]).T.astype(jnp.bfloat16)          # (H, 4H)
    b = reorder_gates((params["b_ih"] + params["b_hh"])[:, None]).T      # (1, 4H) f32

    wd = jnp.zeros((H, dense_pad), jnp.float32).at[:, :D].set(params["w_dense"].T)
    bd = jnp.zeros((1, dense_pad), jnp.float32).at[0, :D].set(params["b_dense"])
    wo = jnp.zeros((dense_pad, out_pad), jnp.float32).at[:D, :2].set(params["w_out"].T)
    bo = jnp.zeros((1, out_pad), jnp.float32).at[0, :2].set(params["b_out"])

    return {
        "w_ih": w_ih, "w_hh": w_hh, "b_lstm": b.astype(jnp.float32),
        "w_dense": wd.astype(jnp.bfloat16), "b_dense": bd,
        "w_out": wo.astype(jnp.bfloat16), "b_out": bo,
    }


def atnet_forward(batch_ids, params, *, dropout_p=0.2, rng_key=None, batch_block=8):
    """Mirrors AtNet.forward(batch, perturbation=None). Returns (pred, embedding)."""
    if rng_key is None:
        rng_key = jax.random.PRNGKey(0)

    # Embedding gather stays in XLA (data-dependent gather glue).
    embedding = jnp.take(params["emb"], batch_ids, axis=0)               # (B, T, E)
    B, T, E = embedding.shape
    H = params["w_hh"].shape[1]
    GH = 4 * H
    DENSE_PAD = 128
    OUT_PAD = 128

    prep = prepare_params(params, dense_pad=DENSE_PAD, out_pad=OUT_PAD)

    # Time-major; batch padded to the grid block size (sublane multiple of 8).
    Bb = batch_block
    Bp = _round_up(B, Bb)
    x_tm = jnp.transpose(embedding, (1, 0, 2)).astype(jnp.float32)       # (T, B, E)
    x_tm = jnp.pad(x_tm, ((0, 0), (0, Bp - B), (0, 0)))

    # Dropout randomness: uniform int32 bits drawn host-side, thresholded in-kernel.
    bits = jax.lax.bitcast_convert_type(
        jax.random.bits(rng_key, (T, Bp, E), dtype=jnp.uint32), jnp.int32)

    kernel = functools.partial(atnet_kernel, dropout_p=float(dropout_p))

    pred_pad = pl.pallas_call(
        kernel,
        out_shape=jax.ShapeDtypeStruct((Bp, OUT_PAD), jnp.float32),
        grid=(Bp // Bb,),
        in_specs=[
            pl.BlockSpec((T, Bb, E), lambda b: (0, b, 0)),               # x (time-major)
            pl.BlockSpec((T, Bb, E), lambda b: (0, b, 0)),               # dropout bits
            pl.BlockSpec((E, GH), lambda b: (0, 0)),                     # w_ih  (bf16)
            pl.BlockSpec((H, GH), lambda b: (0, 0)),                     # w_hh  (bf16)
            pl.BlockSpec((1, GH), lambda b: (0, 0)),                     # b_ih + b_hh
            pl.BlockSpec((H, DENSE_PAD), lambda b: (0, 0)),              # w_dense (bf16, padded)
            pl.BlockSpec((1, DENSE_PAD), lambda b: (0, 0)),              # b_dense (padded)
            pl.BlockSpec((DENSE_PAD, OUT_PAD), lambda b: (0, 0)),        # w_out (bf16, padded)
            pl.BlockSpec((1, OUT_PAD), lambda b: (0, 0)),                # b_out (padded)
        ],
        out_specs=pl.BlockSpec((Bb, OUT_PAD), lambda b: (b, 0)),
        scratch_shapes=[
            pltpu.VMEM((T, Bb, GH), jnp.float32),   # hoisted input projection X@W_ih + b
            pltpu.VMEM((Bb, H), jnp.float32),       # h_t
            pltpu.VMEM((Bb, H), jnp.float32),       # c_t
            pltpu.VMEM((Bb, H), jnp.float32),       # running max over time
        ],
        compiler_params=pltpu.CompilerParams(
            dimension_semantics=("parallel",),       # batch blocks -> both TCs on v7x
            vmem_limit_bytes=32 * 1024 * 1024,
        ),
    )(x_tm, bits, prep["w_ih"], prep["w_hh"], prep["b_lstm"],
      prep["w_dense"], prep["b_dense"], prep["w_out"], prep["b_out"])

    pred = jnp.squeeze(pred_pad[:B, :2])   # .squeeze() as in the torch module
    return pred, embedding


if __name__ == "__main__":
    # Small shapes consistent with the module (defaults scaled down, lane-aligned):
    # vocab=50, emb_dim=128, batch=2, seq=8, lstm_units=128, dense_units=30.
    VOCAB, EMB, B, T, H, D = 50, 128, 2, 8, 128, 30
    key = jax.random.PRNGKey(0)
    k_par, k_ids, k_drop = jax.random.split(key, 3)
    params = init_params(k_par, VOCAB, EMB, H, D)
    batch_ids = jax.random.randint(k_ids, (B, T), 0, VOCAB, dtype=jnp.int32)

    pred, embedding = atnet_forward(batch_ids, params, dropout_p=0.2, rng_key=k_drop)
    jax.block_until_ready((pred, embedding))
    assert pred.shape == (B, 2)
    assert embedding.shape == (B, T, EMB)
    assert bool(jnp.all(jnp.isfinite(pred)))
    print("KERNEL_OK")
</pallas_src>

<mosaic_0001>
module attributes {stable_mosaic.version = 11 : i64} {
  func.func @atnet_kernel(%arg0: i32, %arg1: memref<8x8x128xf32, #tpu.memory_space<vmem>>, %arg2: memref<8x8x128xi32, #tpu.memory_space<vmem>>, %arg3: memref<128x512xbf16, #tpu.memory_space<vmem>>, %arg4: memref<128x512xbf16, #tpu.memory_space<vmem>>, %arg5: memref<1x512xf32, #tpu.memory_space<vmem>>, %arg6: memref<128x128xbf16, #tpu.memory_space<vmem>>, %arg7: memref<1x128xf32, #tpu.memory_space<vmem>>, %arg8: memref<128x128xbf16, #tpu.memory_space<vmem>>, %arg9: memref<1x128xf32, #tpu.memory_space<vmem>>, %arg10: memref<8x128xf32, #tpu.memory_space<vmem>>, %arg11: memref<8x8x512xf32, #tpu.memory_space<vmem>>, %arg12: memref<8x128xf32, #tpu.memory_space<vmem>>, %arg13: memref<8x128xf32, #tpu.memory_space<vmem>>, %arg14: memref<8x128xf32, #tpu.memory_space<vmem>>) attributes {dimension_semantics = [#tpu.dimension_semantics<parallel>], iteration_bounds = array<i64: 1>, scalar_prefetch = 0 : i64, scratch_operands = 4 : i64, tpu.core_type = #tpu.core_type<tc>, window_params = [{transform_indices = @transform_0, window_bounds = array<i64: 8, 8, 128>}, {transform_indices = @transform_1, window_bounds = array<i64: 8, 8, 128>}, {pipeline_mode = #tpu.pipeline_mode<synchronous>, transform_indices = @transform_2, window_bounds = array<i64: 128, 512>}, {pipeline_mode = #tpu.pipeline_mode<synchronous>, transform_indices = @transform_3, window_bounds = array<i64: 128, 512>}, {pipeline_mode = #tpu.pipeline_mode<synchronous>, transform_indices = @transform_4, window_bounds = array<i64: 1, 512>}, {pipeline_mode = #tpu.pipeline_mode<synchronous>, transform_indices = @transform_5, window_bounds = array<i64: 128, 128>}, {pipeline_mode = #tpu.pipeline_mode<synchronous>, transform_indices = @transform_6, window_bounds = array<i64: 1, 128>}, {pipeline_mode = #tpu.pipeline_mode<synchronous>, transform_indices = @transform_7, window_bounds = array<i64: 128, 128>}, {pipeline_mode = #tpu.pipeline_mode<synchronous>, transform_indices = @transform_8, window_bounds = array<i64: 1, 128>}, {transform_indices = @transform_9, window_bounds = array<i64: 8, 128>}]} {
    %c0 = arith.constant 0 : index
    %c0_0 = arith.constant 0 : index
    %c0_1 = arith.constant 0 : index
    %0 = vector.load %arg2[%c0, %c0_0, %c0_1] : memref<8x8x128xi32, #tpu.memory_space<vmem>>, vector<8x8x128xi32>
    %c-1288490189_i32 = arith.constant -1288490189 : i32
    %1 = vector.broadcast %c-1288490189_i32 : i32 to vector<8x8x128xi32>
    %2 = arith.cmpi sge, %0, %1 : vector<8x8x128xi32>
    %3 = arith.extui %2 : vector<8x8x128xi1> to vector<8x8x128xi32>
    %4 = arith.sitofp %3 : vector<8x8x128xi32> to vector<8x8x128xf32>
    %c0_2 = arith.constant 0 : index
    %c0_3 = arith.constant 0 : index
    %c0_4 = arith.constant 0 : index
    %5 = vector.load %arg1[%c0_2, %c0_3, %c0_4] : memref<8x8x128xf32, #tpu.memory_space<vmem>>, vector<8x8x128xf32>
    %6 = arith.mulf %5, %4 : vector<8x8x128xf32>
    %cst = arith.constant 1.250000e+00 : f32
    %7 = vector.broadcast %cst : f32 to vector<8x8x128xf32>
    %8 = arith.mulf %6, %7 : vector<8x8x128xf32>
    %9 = vector.shape_cast %8 : vector<8x8x128xf32> to vector<64x128xf32>
    %10 = arith.truncf %9 : vector<64x128xf32> to vector<64x128xbf16>
    %c0_5 = arith.constant 0 : index
    %c0_6 = arith.constant 0 : index
    %11 = vector.load %arg3[%c0_5, %c0_6] : memref<128x512xbf16, #tpu.memory_space<vmem>>, vector<128x512xbf16>
    %cst_7 = arith.constant dense<0.000000e+00> : vector<64x512xf32>
    %12 = tpu.matmul %10, %11, %cst_7 {dimension_numbers = #tpu.dot_dimension_numbers<[1], [0], [0], [1], [0, 0, 1, 1], [], []>} : vector<64x128xbf16>, vector<128x512xbf16>, vector<64x512xf32> -> vector<64x512xf32>
    %c0_8 = arith.constant 0 : index
    %c0_9 = arith.constant 0 : index
    %13 = vector.load %arg5[%c0_8, %c0_9] : memref<1x512xf32, #tpu.memory_space<vmem>>, vector<1x512xf32>
    %14 = vector.broadcast %13 : vector<1x512xf32> to vector<64x512xf32>
    %15 = arith.addf %12, %14 : vector<64x512xf32>
    %16 = vector.shape_cast %15 : vector<64x512xf32> to vector<8x8x512xf32>
    %c0_10 = arith.constant 0 : index
    %c0_11 = arith.constant 0 : index
    %c0_12 = arith.constant 0 : index
    %17 = vector.load %arg11[%c0_10, %c0_11, %c0_12] : memref<8x8x512xf32, #tpu.memory_space<vmem>>, vector<8x8x512xf32>
    tpu.vector_store %arg11[%c0_10, %c0_11, %c0_12], %16 {strides = array<i32>} : memref<8x8x512xf32, #tpu.memory_space<vmem>>, vector<8x8x512xf32>,
    %cst_13 = arith.constant 0.000000e+00 : f32
    %18 = vector.broadcast %cst_13 : f32 to vector<8x128xf32>
    %c0_14 = arith.constant 0 : index
    %c0_15 = arith.constant 0 : index
    %19 = vector.load %arg12[%c0_14, %c0_15] : memref<8x128xf32, #tpu.memory_space<vmem>>, vector<8x128xf32>
    tpu.vector_store %arg12[%c0_14, %c0_15], %18 {strides = array<i32>} : memref<8x128xf32, #tpu.memory_space<vmem>>, vector<8x128xf32>,
    %cst_16 = arith.constant 0.000000e+00 : f32
    %20 = vector.broadcast %cst_16 : f32 to vector<8x128xf32>
    %c0_17 = arith.constant 0 : index
    %c0_18 = arith.constant 0 : index
    %21 = vector.load %arg13[%c0_17, %c0_18] : memref<8x128xf32, #tpu.memory_space<vmem>>, vector<8x128xf32>
    tpu.vector_store %arg13[%c0_17, %c0_18], %20 {strides = array<i32>} : memref<8x128xf32, #tpu.memory_space<vmem>>, vector<8x128xf32>,
    %cst_19 = arith.constant 0xFF800000 : f32
    %22 = vector.broadcast %cst_19 : f32 to vector<8x128xf32>
    %c0_20 = arith.constant 0 : index
    %c0_21 = arith.constant 0 : index
    %23 = vector.load %arg14[%c0_20, %c0_21] : memref<8x128xf32, #tpu.memory_space<vmem>>, vector<8x128xf32>
    tpu.vector_store %arg14[%c0_20, %c0_21], %22 {strides = array<i32>} : memref<8x128xf32, #tpu.memory_space<vmem>>, vector<8x128xf32>,
    %c0_i32 = arith.constant 0 : i32
    %24 = arith.index_cast %c0_i32 : i32 to index
    %c0_22 = arith.constant 0 : index
    %c0_23 = arith.constant 0 : index
    %25 = vector.load %arg11[%24, %c0_22, %c0_23] : memref<8x8x512xf32, #tpu.memory_space<vmem>>, vector<1x8x512xf32>
    %26 = vector.shape_cast %25 : vector<1x8x512xf32> to vector<8x512xf32>
    %c0_24 = arith.constant 0 : index
    %c0_25 = arith.constant 0 : index
    %27 = vector.load %arg12[%c0_24, %c0_25] : memref<8x128xf32, #tpu.memory_space<vmem>>, vector<8x128xf32>
    %28 = arith.truncf %27 : vector<8x128xf32> to vector<8x128xbf16>
    %c0_26 = arith.constant 0 : index
    %c0_27 = arith.constant 0 : index
    %29 = vector.load %arg4[%c0_26, %c0_27] : memref<128x512xbf16, #tpu.memory_space<vmem>>, vector<128x512xbf16>
    %cst_28 = arith.constant dense<0.000000e+00> : vector<8x512xf32>
    %30 = tpu.matmul %28, %29, %cst_28 {dimension_numbers = #tpu.dot_dimension_numbers<[1], [0], [0], [1], [0, 0, 1, 1], [], []>} : vector<8x128xbf16>, vector<128x512xbf16>, vector<8x512xf32> -> vector<8x512xf32>
    %31 = arith.addf %26, %30 : vector<8x512xf32>
    %32 = vector.extract_strided_slice %31 {offsets = [0, 0], sizes = [8, 384], strides = [1, 1]} : vector<8x512xf32> to vector<8x384xf32>
    %33 = arith.negf %32 : vector<8x384xf32>
    %34 = math.exp %33 : vector<8x384xf32>
    %cst_29 = arith.constant 1.000000e+00 : f32
    %35 = vector.broadcast %cst_29 : f32 to vector<8x384xf32>
    %36 = arith.addf %35, %34 : vector<8x384xf32>
    %37 = arith.divf %35, %36 : vector<8x384xf32>
    %38 = vector.extract_strided_slice %37 {offsets = [0, 0], sizes = [8, 128], strides = [1, 1]} : vector<8x384xf32> to vector<8x128xf32>
    %39 = vector.extract_strided_slice %37 {offsets = [0, 128], sizes = [8, 128], strides = [1, 1]} : vector<8x384xf32> to vector<8x128xf32>
    %40 = vector.extract_strided_slice %37 {offsets = [0, 256], sizes = [8, 128], strides = [1, 1]} : vector<8x384xf32> to vector<8x128xf32>
    %41 = vector.extract_strided_slice %31 {offsets = [0, 384], sizes = [8, 128], strides = [1, 1]} : vector<8x512xf32> to vector<8x128xf32>
    %42 = math.tanh %41 : vector<8x128xf32>
    %c0_30 = arith.constant 0 : index
    %c0_31 = arith.constant 0 : index
    %43 = vector.load %arg13[%c0_30, %c0_31] : memref<8x128xf32, #tpu.memory_space<vmem>>, vector<8x128xf32>
    %44 = arith.mulf %39, %43 : vector<8x128xf32>
    %45 = arith.mulf %38, %42 : vector<8x128xf32>
    %46 = arith.addf %44, %45 : vector<8x128xf32>
    %47 = math.tanh %46 : vector<8x128xf32>
    %48 = arith.mulf %40, %47 : vector<8x128xf32>
    %c0_32 = arith.constant 0 : index
    %c0_33 = arith.constant 0 : index
    %49 = vector.load %arg13[%c0_32, %c0_33] : memref<8x128xf32, #tpu.memory_space<vmem>>, vector<8x128xf32>
    tpu.vector_store %arg13[%c0_32, %c0_33], %46 {strides = array<i32>} : memref<8x128xf32, #tpu.memory_space<vmem>>, vector<8x128xf32>,
    %c0_34 = arith.constant 0 : index
    %c0_35 = arith.constant 0 : index
    %50 = vector.load %arg12[%c0_34, %c0_35] : memref<8x128xf32, #tpu.memory_space<vmem>>, vector<8x128xf32>
    tpu.vector_store %arg12[%c0_34, %c0_35], %48 {strides = array<i32>} : memref<8x128xf32, #tpu.memory_space<vmem>>, vector<8x128xf32>,
    %c0_36 = arith.constant 0 : index
    %c0_37 = arith.constant 0 : index
    %51 = vector.load %arg14[%c0_36, %c0_37] : memref<8x128xf32, #tpu.memory_space<vmem>>, vector<8x128xf32>
    %52 = arith.maximumf %51, %48 : vector<8x128xf32>
    %c0_38 = arith.constant 0 : index
    %c0_39 = arith.constant 0 : index
    %53 = vector.load %arg14[%c0_38, %c0_39] : memref<8x128xf32, #tpu.memory_space<vmem>>, vector<8x128xf32>
    tpu.vector_store %arg14[%c0_38, %c0_39], %52 {strides = array<i32>} : memref<8x128xf32, #tpu.memory_space<vmem>>, vector<8x128xf32>,
    %c1_i32 = arith.constant 1 : i32
    %54 = arith.index_cast %c1_i32 : i32 to index
    %c0_40 = arith.constant 0 : index
    %c0_41 = arith.constant 0 : index
    %55 = vector.load %arg11[%54, %c0_40, %c0_41] : memref<8x8x512xf32, #tpu.memory_space<vmem>>, vector<1x8x512xf32>
    %56 = vector.shape_cast %55 : vector<1x8x512xf32> to vector<8x512xf32>
    %c0_42 = arith.constant 0 : index
    %c0_43 = arith.constant 0 : index
    %57 = vector.load %arg12[%c0_42, %c0_43] : memref<8x128xf32, #tpu.memory_space<vmem>>, vector<8x128xf32>
    %58 = arith.truncf %57 : vector<8x128xf32> to vector<8x128xbf16>
    %c0_44 = arith.constant 0 : index
    %c0_45 = arith.constant 0 : index
    %59 = vector.load %arg4[%c0_44, %c0_45] : memref<128x512xbf16, #tpu.memory_space<vmem>>, vector<128x512xbf16>
    %cst_46 = arith.constant dense<0.000000e+00> : vector<8x512xf32>
    %60 = tpu.matmul %58, %59, %cst_46 {dimension_numbers = #tpu.dot_dimension_numbers<[1], [0], [0], [1], [0, 0, 1, 1], [], []>} : vector<8x128xbf16>, vector<128x512xbf16>, vector<8x512xf32> -> vector<8x512xf32>
    %61 = arith.addf %56, %60 : vector<8x512xf32>
    %62 = vector.extract_strided_slice %61 {offsets = [0, 0], sizes = [8, 384], strides = [1, 1]} : vector<8x512xf32> to vector<8x384xf32>
    %63 = arith.negf %62 : vector<8x384xf32>
    %64 = math.exp %63 : vector<8x384xf32>
    %cst_47 = arith.constant 1.000000e+00 : f32
    %65 = vector.broadcast %cst_47 : f32 to vector<8x384xf32>
    %66 = arith.addf %65, %64 : vector<8x384xf32>
    %67 = arith.divf %65, %66 : vector<8x384xf32>
    %68 = vector.extract_strided_slice %67 {offsets = [0, 0], sizes = [8, 128], strides = [1, 1]} : vector<8x384xf32> to vector<8x128xf32>
    %69 = vector.extract_strided_slice %67 {offsets = [0, 128], sizes = [8, 128], strides = [1, 1]} : vector<8x384xf32> to vector<8x128xf32>
    %70 = vector.extract_strided_slice %67 {offsets = [0, 256], sizes = [8, 128], strides = [1, 1]} : vector<8x384xf32> to vector<8x128xf32>
    %71 = vector.extract_strided_slice %61 {offsets = [0, 384], sizes = [8, 128], strides = [1, 1]} : vector<8x512xf32> to vector<8x128xf32>
    %72 = math.tanh %71 : vector<8x128xf32>
    %c0_48 = arith.constant 0 : index
    %c0_49 = arith.constant 0 : index
    %73 = vector.load %arg13[%c0_48, %c0_49] : memref<8x128xf32, #tpu.memory_space<vmem>>, vector<8x128xf32>
    %74 = arith.mulf %69, %73 : vector<8x128xf32>
    %75 = arith.mulf %68, %72 : vector<8x128xf32>
    %76 = arith.addf %74, %75 : vector<8x128xf32>
    %77 = math.tanh %76 : vector<8x128xf32>
    %78 = arith.mulf %70, %77 : vector<8x128xf32>
    %c0_50 = arith.constant 0 : index
    %c0_51 = arith.constant 0 : index
    %79 = vector.load %arg13[%c0_50, %c0_51] : memref<8x128xf32, #tpu.memory_space<vmem>>, vector<8x128xf32>
    tpu.vector_store %arg13[%c0_50, %c0_51], %76 {strides = array<i32>} : memref<8x128xf32, #tpu.memory_space<vmem>>, vector<8x128xf32>,
    %c0_52 = arith.constant 0 : index
    %c0_53 = arith.constant 0 : index
    %80 = vector.load %arg12[%c0_52, %c0_53] : memref<8x128xf32, #tpu.memory_space<vmem>>, vector<8x128xf32>
    tpu.vector_store %arg12[%c0_52, %c0_53], %78 {strides = array<i32>} : memref<8x128xf32, #tpu.memory_space<vmem>>, vector<8x128xf32>,
    %c0_54 = arith.constant 0 : index
    %c0_55 = arith.constant 0 : index
    %81 = vector.load %arg14[%c0_54, %c0_55] : memref<8x128xf32, #tpu.memory_space<vmem>>, vector<8x128xf32>
    %82 = arith.maximumf %81, %78 : vector<8x128xf32>
    %c0_56 = arith.constant 0 : index
    %c0_57 = arith.constant 0 : index
    %83 = vector.load %arg14[%c0_56, %c0_57] : memref<8x128xf32, #tpu.memory_space<vmem>>, vector<8x128xf32>
    tpu.vector_store %arg14[%c0_56, %c0_57], %82 {strides = array<i32>} : memref<8x128xf32, #tpu.memory_space<vmem>>, vector<8x128xf32>,
    %c2_i32 = arith.constant 2 : i32
    %84 = arith.index_cast %c2_i32 : i32 to index
    %c0_58 = arith.constant 0 : index
    %c0_59 = arith.constant 0 : index
    %85 = vector.load %arg11[%84, %c0_58, %c0_59] : memref<8x8x512xf32, #tpu.memory_space<vmem>>, vector<1x8x512xf32>
    %86 = vector.shape_cast %85 : vector<1x8x512xf32> to vector<8x512xf32>
    %c0_60 = arith.constant 0 : index
    %c0_61 = arith.constant 0 : index
    %87 = vector.load %arg12[%c0_60, %c0_61] : memref<8x128xf32, #tpu.memory_space<vmem>>, vector<8x128xf32>
    %88 = arith.truncf %87 : vector<8x128xf32> to vector<8x128xbf16>
    %c0_62 = arith.constant 0 : index
    %c0_63 = arith.constant 0 : index
    %89 = vector.load %arg4[%c0_62, %c0_63] : memref<128x512xbf16, #tpu.memory_space<vmem>>, vector<128x512xbf16>
    %cst_64 = arith.constant dense<0.000000e+00> : vector<8x512xf32>
    %90 = tpu.matmul %88, %89, %cst_64 {dimension_numbers = #tpu.dot_dimension_numbers<[1], [0], [0], [1], [0, 0, 1, 1], [], []>} : vector<8x128xbf16>, vector<128x512xbf16>, vector<8x512xf32> -> vector<8x512xf32>
    %91 = arith.addf %86, %90 : vector<8x512xf32>
    %92 = vector.extract_strided_slice %91 {offsets = [0, 0], sizes = [8, 384], strides = [1, 1]} : vector<8x512xf32> to vector<8x384xf32>
    %93 = arith.negf %92 : vector<8x384xf32>
    %94 = math.exp %93 : vector<8x384xf32>
    %cst_65 = arith.constant 1.000000e+00 : f32
    %95 = vector.broadcast %cst_65 : f32 to vector<8x384xf32>
    %96 = arith.addf %95, %94 : vector<8x384xf32>
    %97 = arith.divf %95, %96 : vector<8x384xf32>
    %98 = vector.extract_strided_slice %97 {offsets = [0, 0], sizes = [8, 128], strides = [1, 1]} : vector<8x384xf32> to vector<8x128xf32>
    %99 = vector.extract_strided_slice %97 {offsets = [0, 128], sizes = [8, 128], strides = [1, 1]} : vector<8x384xf32> to vector<8x128xf32>
    %100 = vector.extract_strided_slice %97 {offsets = [0, 256], sizes = [8, 128], strides = [1, 1]} : vector<8x384xf32> to vector<8x128xf32>
    %101 = vector.extract_strided_slice %91 {offsets = [0, 384], sizes = [8, 128], strides = [1, 1]} : vector<8x512xf32> to vector<8x128xf32>
    %102 = math.tanh %101 : vector<8x128xf32>
    %c0_66 = arith.constant 0 : index
    %c0_67 = arith.constant 0 : index
    %103 = vector.load %arg13[%c0_66, %c0_67] : memref<8x128xf32, #tpu.memory_space<vmem>>, vector<8x128xf32>
    %104 = arith.mulf %99, %103 : vector<8x128xf32>
    %105 = arith.mulf %98, %102 : vector<8x128xf32>
    %106 = arith.addf %104, %105 : vector<8x128xf32>
    %107 = math.tanh %106 : vector<8x128xf32>
    %108 = arith.mulf %100, %107 : vector<8x128xf32>
    %c0_68 = arith.constant 0 : index
    %c0_69 = arith.constant 0 : index
    %109 = vector.load %arg13[%c0_68, %c0_69] : memref<8x128xf32, #tpu.memory_space<vmem>>, vector<8x128xf32>
    tpu.vector_store %arg13[%c0_68, %c0_69], %106 {strides = array<i32>} : memref<8x128xf32, #tpu.memory_space<vmem>>, vector<8x128xf32>,
    %c0_70 = arith.constant 0 : index
    %c0_71 = arith.constant 0 : index
    %110 = vector.load %arg12[%c0_70, %c0_71] : memref<8x128xf32, #tpu.memory_space<vmem>>, vector<8x128xf32>
    tpu.vector_store %arg12[%c0_70, %c0_71], %108 {strides = array<i32>} : memref<8x128xf32, #tpu.memory_space<vmem>>, vector<8x128xf32>,
    %c0_72 = arith.constant 0 : index
    %c0_73 = arith.constant 0 : index
    %111 = vector.load %arg14[%c0_72, %c0_73] : memref<8x128xf32, #tpu.memory_space<vmem>>, vector<8x128xf32>
    %112 = arith.maximumf %111, %108 : vector<8x128xf32>
    %c0_74 = arith.constant 0 : index
    %c0_75 = arith.constant 0 : index
    %113 = vector.load %arg14[%c0_74, %c0_75] : memref<8x128xf32, #tpu.memory_space<vmem>>, vector<8x128xf32>
    tpu.vector_store %arg14[%c0_74, %c0_75], %112 {strides = array<i32>} : memref<8x128xf32, #tpu.memory_space<vmem>>, vector<8x128xf32>,
    %c3_i32 = arith.constant 3 : i32
    %114 = arith.index_cast %c3_i32 : i32 to index
    %c0_76 = arith.constant 0 : index
    %c0_77 = arith.constant 0 : index
    %115 = vector.load %arg11[%114, %c0_76, %c0_77] : memref<8x8x512xf32, #tpu.memory_space<vmem>>, vector<1x8x512xf32>
    %116 = vector.shape_cast %115 : vector<1x8x512xf32> to vector<8x512xf32>
    %c0_78 = arith.constant 0 : index
    %c0_79 = arith.constant 0 : index
    %117 = vector.load %arg12[%c0_78, %c0_79] : memref<8x128xf32, #tpu.memory_space<vmem>>, vector<8x128xf32>
    %118 = arith.truncf %117 : vector<8x128xf32> to vector<8x128xbf16>
    %c0_80 = arith.constant 0 : index
    %c0_81 = arith.constant 0 : index
    %119 = vector.load %arg4[%c0_80, %c0_81] : memref<128x512xbf16, #tpu.memory_space<vmem>>, vector<128x512xbf16>
    %cst_82 = arith.constant dense<0.000000e+00> : vector<8x512xf32>
    %120 = tpu.matmul %118, %119, %cst_82 {dimension_numbers = #tpu.dot_dimension_numbers<[1], [0], [0], [1], [0, 0, 1, 1], [], []>} : vector<8x128xbf16>, vector<128x512xbf16>, vector<8x512xf32> -> vector<8x512xf32>
    %121 = arith.addf %116, %120 : vector<8x512xf32>
    %122 = vector.extract_strided_slice %121 {offsets = [0, 0], sizes = [8, 384], strides = [1, 1]} : vector<8x512xf32> to vector<8x384xf32>
    %123 = arith.negf %122 : vector<8x384xf32>
    %124 = math.exp %123 : vector<8x384xf32>
    %cst_83 = arith.constant 1.000000e+00 : f32
    %125 = vector.broadcast %cst_83 : f32 to vector<8x384xf32>
    %126 = arith.addf %125, %124 : vector<8x384xf32>
    %127 = arith.divf %125, %126 : vector<8x384xf32>
    %128 = vector.extract_strided_slice %127 {offsets = [0, 0], sizes = [8, 128], strides = [1, 1]} : vector<8x384xf32> to vector<8x128xf32>
    %129 = vector.extract_strided_slice %127 {offsets = [0, 128], sizes = [8, 128], strides = [1, 1]} : vector<8x384xf32> to vector<8x128xf32>
    %130 = vector.extract_strided_slice %127 {offsets = [0, 256], sizes = [8, 128], strides = [1, 1]} : vector<8x384xf32> to vector<8x128xf32>
    %131 = vector.extract_strided_slice %121 {offsets = [0, 384], sizes = [8, 128], strides = [1, 1]} : vector<8x512xf32> to vector<8x128xf32>
    %132 = math.tanh %131 : vector<8x128xf32>
    %c0_84 = arith.constant 0 : index
    %c0_85 = arith.constant 0 : index
    %133 = vector.load %arg13[%c0_84, %c0_85] : memref<8x128xf32, #tpu.memory_space<vmem>>, vector<8x128xf32>
    %134 = arith.mulf %129, %133 : vector<8x128xf32>
    %135 = arith.mulf %128, %132 : vector<8x128xf32>
    %136 = arith.addf %134, %135 : vector<8x128xf32>
    %137 = math.tanh %136 : vector<8x128xf32>
    %138 = arith.mulf %130, %137 : vector<8x128xf32>
    %c0_86 = arith.constant 0 : index
    %c0_87 = arith.constant 0 : index
    %139 = vector.load %arg13[%c0_86, %c0_87] : memref<8x128xf32, #tpu.memory_space<vmem>>, vector<8x128xf32>
    tpu.vector_store %arg13[%c0_86, %c0_87], %136 {strides = array<i32>} : memref<8x128xf32, #tpu.memory_space<vmem>>, vector<8x128xf32>,
    %c0_88 = arith.constant 0 : index
    %c0_89 = arith.constant 0 : index
    %140 = vector.load %arg12[%c0_88, %c0_89] : memref<8x128xf32, #tpu.memory_space<vmem>>, vector<8x128xf32>
    tpu.vector_store %arg12[%c0_88, %c0_89], %138 {strides = array<i32>} : memref<8x128xf32, #tpu.memory_space<vmem>>, vector<8x128xf32>,
    %c0_90 = arith.constant 0 : index
    %c0_91 = arith.constant 0 : index
    %141 = vector.load %arg14[%c0_90, %c0_91] : memref<8x128xf32, #tpu.memory_space<vmem>>, vector<8x128xf32>
    %142 = arith.maximumf %141, %138 : vector<8x128xf32>
    %c0_92 = arith.constant 0 : index
    %c0_93 = arith.constant 0 : index
    %143 = vector.load %arg14[%c0_92, %c0_93] : memref<8x128xf32, #tpu.memory_space<vmem>>, vector<8x128xf32>
    tpu.vector_store %arg14[%c0_92, %c0_93], %142 {strides = array<i32>} : memref<8x128xf32, #tpu.memory_space<vmem>>, vector<8x128xf32>,
    %c4_i32 = arith.constant 4 : i32
    %144 = arith.index_cast %c4_i32 : i32 to index
    %c0_94 = arith.constant 0 : index
    %c0_95 = arith.constant 0 : index
    %145 = vector.load %arg11[%144, %c0_94, %c0_95] : memref<8x8x512xf32, #tpu.memory_space<vmem>>, vector<1x8x512xf32>
    %146 = vector.shape_cast %145 : vector<1x8x512xf32> to vector<8x512xf32>
    %c0_96 = arith.constant 0 : index
    %c0_97 = arith.constant 0 : index
    %147 = vector.load %arg12[%c0_96, %c0_97] : memref<8x128xf32, #tpu.memory_space<vmem>>, vector<8x128xf32>
    %148 = arith.truncf %147 : vector<8x128xf32> to vector<8x128xbf16>
    %c0_98 = arith.constant 0 : index
    %c0_99 = arith.constant 0 : index
    %149 = vector.load %arg4[%c0_98, %c0_99] : memref<128x512xbf16, #tpu.memory_space<vmem>>, vector<128x512xbf16>
    %cst_100 = arith.constant dense<0.000000e+00> : vector<8x512xf32>
    %150 = tpu.matmul %148, %149, %cst_100 {dimension_numbers = #tpu.dot_dimension_numbers<[1], [0], [0], [1], [0, 0, 1, 1], [], []>} : vector<8x128xbf16>, vector<128x512xbf16>, vector<8x512xf32> -> vector<8x512xf32>
    %151 = arith.addf %146, %150 : vector<8x512xf32>
    %152 = vector.extract_strided_slice %151 {offsets = [0, 0], sizes = [8, 384], strides = [1, 1]} : vector<8x512xf32> to vector<8x384xf32>
    %153 = arith.negf %152 : vector<8x384xf32>
    %154 = math.exp %153 : vector<8x384xf32>
    %cst_101 = arith.constant 1.000000e+00 : f32
    %155 = vector.broadcast %cst_101 : f32 to vector<8x384xf32>
    %156 = arith.addf %155, %154 : vector<8x384xf32>
    %157 = arith.divf %155, %156 : vector<8x384xf32>
    %158 = vector.extract_strided_slice %157 {offsets = [0, 0], sizes = [8, 128], strides = [1, 1]} : vector<8x384xf32> to vector<8x128xf32>
    %159 = vector.extract_strided_slice %157 {offsets = [0, 128], sizes = [8, 128], strides = [1, 1]} : vector<8x384xf32> to vector<8x128xf32>
    %160 = vector.extract_strided_slice %157 {offsets = [0, 256], sizes = [8, 128], strides = [1, 1]} : vector<8x384xf32> to vector<8x128xf32>
    %161 = vector.extract_strided_slice %151 {offsets = [0, 384], sizes = [8, 128], strides = [1, 1]} : vector<8x512xf32> to vector<8x128xf32>
    %162 = math.tanh %161 : vector<8x128xf32>
    %c0_102 = arith.constant 0 : index
    %c0_103 = arith.constant 0 : index
    %163 = vector.load %arg13[%c0_102, %c0_103] : memref<8x128xf32, #tpu.memory_space<vmem>>, vector<8x128xf32>
    %164 = arith.mulf %159, %163 : vector<8x128xf32>
    %165 = arith.mulf %158, %162 : vector<8x128xf32>
    %166 = arith.addf %164, %165 : vector<8x128xf32>
    %167 = math.tanh %166 : vector<8x128xf32>
    %168 = arith.mulf %160, %167 : vector<8x128xf32>
    %c0_104 = arith.constant 0 : index
    %c0_105 = arith.constant 0 : index
    %169 = vector.load %arg13[%c0_104, %c0_105] : memref<8x128xf32, #tpu.memory_space<vmem>>, vector<8x128xf32>
    tpu.vector_store %arg13[%c0_104, %c0_105], %166 {strides = array<i32>} : memref<8x128xf32, #tpu.memory_space<vmem>>, vector<8x128xf32>,
    %c0_106 = arith.constant 0 : index
    %c0_107 = arith.constant 0 : index
    %170 = vector.load %arg12[%c0_106, %c0_107] : memref<8x128xf32, #tpu.memory_space<vmem>>, vector<8x128xf32>
    tpu.vector_store %arg12[%c0_106, %c0_107], %168 {strides = array<i32>} : memref<8x128xf32, #tpu.memory_space<vmem>>, vector<8x128xf32>,
    %c0_108 = arith.constant 0 : index
    %c0_109 = arith.constant 0 : index
    %171 = vector.load %arg14[%c0_108, %c0_109] : memref<8x128xf32, #tpu.memory_space<vmem>>, vector<8x128xf32>
    %172 = arith.maximumf %171, %168 : vector<8x128xf32>
    %c0_110 = arith.constant 0 : index
    %c0_111 = arith.constant 0 : index
    %173 = vector.load %arg14[%c0_110, %c0_111] : memref<8x128xf32, #tpu.memory_space<vmem>>, vector<8x128xf32>
    tpu.vector_store %arg14[%c0_110, %c0_111], %172 {strides = array<i32>} : memref<8x128xf32, #tpu.memory_space<vmem>>, vector<8x128xf32>,
    %c5_i32 = arith.constant 5 : i32
    %174 = arith.index_cast %c5_i32 : i32 to index
    %c0_112 = arith.constant 0 : index
    %c0_113 = arith.constant 0 : index
    %175 = vector.load %arg11[%174, %c0_112, %c0_113] : memref<8x8x512xf32, #tpu.memory_space<vmem>>, vector<1x8x512xf32>
    %176 = vector.shape_cast %175 : vector<1x8x512xf32> to vector<8x512xf32>
    %c0_114 = arith.constant 0 : index
    %c0_115 = arith.constant 0 : index
    %177 = vector.load %arg12[%c0_114, %c0_115] : memref<8x128xf32, #tpu.memory_space<vmem>>, vector<8x128xf32>
    %178 = arith.truncf %177 : vector<8x128xf32> to vector<8x128xbf16>
    %c0_116 = arith.constant 0 : index
    %c0_117 = arith.constant 0 : index
    %179 = vector.load %arg4[%c0_116, %c0_117] : memref<128x512xbf16, #tpu.memory_space<vmem>>, vector<128x512xbf16>
    %cst_118 = arith.constant dense<0.000000e+00> : vector<8x512xf32>
    %180 = tpu.matmul %178, %179, %cst_118 {dimension_numbers = #tpu.dot_dimension_numbers<[1], [0], [0], [1], [0, 0, 1, 1], [], []>} : vector<8x128xbf16>, vector<128x512xbf16>, vector<8x512xf32> -> vector<8x512xf32>
    %181 = arith.addf %176, %180 : vector<8x512xf32>
    %182 = vector.extract_strided_slice %181 {offsets = [0, 0], sizes = [8, 384], strides = [1, 1]} : vector<8x512xf32> to vector<8x384xf32>
    %183 = arith.negf %182 : vector<8x384xf32>
    %184 = math.exp %183 : vector<8x384xf32>
    %cst_119 = arith.constant 1.000000e+00 : f32
    %185 = vector.broadcast %cst_119 : f32 to vector<8x384xf32>
    %186 = arith.addf %185, %184 : vector<8x384xf32>
    %187 = arith.divf %185, %186 : vector<8x384xf32>
    %188 = vector.extract_strided_slice %187 {offsets = [0, 0], sizes = [8, 128], strides = [1, 1]} : vector<8x384xf32> to vector<8x128xf32>
    %189 = vector.extract_strided_slice %187 {offsets = [0, 128], sizes = [8, 128], strides = [1, 1]} : vector<8x384xf32> to vector<8x128xf32>
    %190 = vector.extract_strided_slice %187 {offsets = [0, 256], sizes = [8, 128], strides = [1, 1]} : vector<8x384xf32> to vector<8x128xf32>
    %191 = vector.extract_strided_slice %181 {offsets = [0, 384], sizes = [8, 128], strides = [1, 1]} : vector<8x512xf32> to vector<8x128xf32>
    %192 = math.tanh %191 : vector<8x128xf32>
    %c0_120 = arith.constant 0 : index
    %c0_121 = arith.constant 0 : index
    %193 = vector.load %arg13[%c0_120, %c0_121] : memref<8x128xf32, #tpu.memory_space<vmem>>, vector<8x128xf32>
    %194 = arith.mulf %189, %193 : vector<8x128xf32>
    %195 = arith.mulf %188, %192 : vector<8x128xf32>
    %196 = arith.addf %194, %195 : vector<8x128xf32>
    %197 = math.tanh %196 : vector<8x128xf32>
    %198 = arith.mulf %190, %197 : vector<8x128xf32>
    %c0_122 = arith.constant 0 : index
    %c0_123 = arith.constant 0 : index
    %199 = vector.load %arg13[%c0_122, %c0_123] : memref<8x128xf32, #tpu.memory_space<vmem>>, vector<8x128xf32>
    tpu.vector_store %arg13[%c0_122, %c0_123], %196 {strides = array<i32>} : memref<8x128xf32, #tpu.memory_space<vmem>>, vector<8x128xf32>,
    %c0_124 = arith.constant 0 : index
    %c0_125 = arith.constant 0 : index
    %200 = vector.load %arg12[%c0_124, %c0_125] : memref<8x128xf32, #tpu.memory_space<vmem>>, vector<8x128xf32>
    tpu.vector_store %arg12[%c0_124, %c0_125], %198 {strides = array<i32>} : memref<8x128xf32, #tpu.memory_space<vmem>>, vector<8x128xf32>,
    %c0_126 = arith.constant 0 : index
    %c0_127 = arith.constant 0 : index
    %201 = vector.load %arg14[%c0_126, %c0_127] : memref<8x128xf32, #tpu.memory_space<vmem>>, vector<8x128xf32>
    %202 = arith.maximumf %201, %198 : vector<8x128xf32>
    %c0_128 = arith.constant 0 : index
    %c0_129 = arith.constant 0 : index
    %203 = vector.load %arg14[%c0_128, %c0_129] : memref<8x128xf32, #tpu.memory_space<vmem>>, vector<8x128xf32>
    tpu.vector_store %arg14[%c0_128, %c0_129], %202 {strides = array<i32>} : memref<8x128xf32, #tpu.memory_space<vmem>>, vector<8x128xf32>,
    %c6_i32 = arith.constant 6 : i32
    %204 = arith.index_cast %c6_i32 : i32 to index
    %c0_130 = arith.constant 0 : index
    %c0_131 = arith.constant 0 : index
    %205 = vector.load %arg11[%204, %c0_130, %c0_131] : memref<8x8x512xf32, #tpu.memory_space<vmem>>, vector<1x8x512xf32>
    %206 = vector.shape_cast %205 : vector<1x8x512xf32> to vector<8x512xf32>
    %c0_132 = arith.constant 0 : index
    %c0_133 = arith.constant 0 : index
    %207 = vector.load %arg12[%c0_132, %c0_133] : memref<8x128xf32, #tpu.memory_space<vmem>>, vector<8x128xf32>
    %208 = arith.truncf %207 : vector<8x128xf32> to vector<8x128xbf16>
    %c0_134 = arith.constant 0 : index
    %c0_135 = arith.constant 0 : index
    %209 = vector.load %arg4[%c0_134, %c0_135] : memref<128x512xbf16, #tpu.memory_space<vmem>>, vector<128x512xbf16>
    %cst_136 = arith.constant dense<0.000000e+00> : vector<8x512xf32>
    %210 = tpu.matmul %208, %209, %cst_136 {dimension_numbers = #tpu.dot_dimension_numbers<[1], [0], [0], [1], [0, 0, 1, 1], [], []>} : vector<8x128xbf16>, vector<128x512xbf16>, vector<8x512xf32> -> vector<8x512xf32>
    %211 = arith.addf %206, %210 : vector<8x512xf32>
    %212 = vector.extract_strided_slice %211 {offsets = [0, 0], sizes = [8, 384], strides = [1, 1]} : vector<8x512xf32> to vector<8x384xf32>
    %213 = arith.negf %212 : vector<8x384xf32>
    %214 = math.exp %213 : vector<8x384xf32>
    %cst_137 = arith.constant 1.000000e+00 : f32
    %215 = vector.broadcast %cst_137 : f32 to vector<8x384xf32>
    %216 = arith.addf %215, %214 : vector<8x384xf32>
    %217 = arith.divf %215, %216 : vector<8x384xf32>
    %218 = vector.extract_strided_slice %217 {offsets = [0, 0], sizes = [8, 128], strides = [1, 1]} : vector<8x384xf32> to vector<8x128xf32>
    %219 = vector.extract_strided_slice %217 {offsets = [0, 128], sizes = [8, 128], strides = [1, 1]} : vector<8x384xf32> to vector<8x128xf32>
    %220 = vector.extract_strided_slice %217 {offsets = [0, 256], sizes = [8, 128], strides = [1, 1]} : vector<8x384xf32> to vector<8x128xf32>
    %221 = vector.extract_strided_slice %211 {offsets = [0, 384], sizes = [8, 128], strides = [1, 1]} : vector<8x512xf32> to vector<8x128xf32>
    %222 = math.tanh %221 : vector<8x128xf32>
    %c0_138 = arith.constant 0 : index
    %c0_139 = arith.constant 0 : index
    %223 = vector.load %arg13[%c0_138, %c0_139] : memref<8x128xf32, #tpu.memory_space<vmem>>, vector<8x128xf32>
    %224 = arith.mulf %219, %223 : vector<8x128xf32>
    %225 = arith.mulf %218, %222 : vector<8x128xf32>
    %226 = arith.addf %224, %225 : vector<8x128xf32>
    %227 = math.tanh %226 : vector<8x128xf32>
    %228 = arith.mulf %220, %227 : vector<8x128xf32>
    %c0_140 = arith.constant 0 : index
    %c0_141 = arith.constant 0 : index
    %229 = vector.load %arg13[%c0_140, %c0_141] : memref<8x128xf32, #tpu.memory_space<vmem>>, vector<8x128xf32>
    tpu.vector_store %arg13[%c0_140, %c0_141], %226 {strides = array<i32>} : memref<8x128xf32, #tpu.memory_space<vmem>>, vector<8x128xf32>,
    %c0_142 = arith.constant 0 : index
    %c0_143 = arith.constant 0 : index
    %230 = vector.load %arg12[%c0_142, %c0_143] : memref<8x128xf32, #tpu.memory_space<vmem>>, vector<8x128xf32>
    tpu.vector_store %arg12[%c0_142, %c0_143], %228 {strides = array<i32>} : memref<8x128xf32, #tpu.memory_space<vmem>>, vector<8x128xf32>,
    %c0_144 = arith.constant 0 : index
    %c0_145 = arith.constant 0 : index
    %231 = vector.load %arg14[%c0_144, %c0_145] : memref<8x128xf32, #tpu.memory_space<vmem>>, vector<8x128xf32>
    %232 = arith.maximumf %231, %228 : vector<8x128xf32>
    %c0_146 = arith.constant 0 : index
    %c0_147 = arith.constant 0 : index
    %233 = vector.load %arg14[%c0_146, %c0_147] : memref<8x128xf32, #tpu.memory_space<vmem>>, vector<8x128xf32>
    tpu.vector_store %arg14[%c0_146, %c0_147], %232 {strides = array<i32>} : memref<8x128xf32, #tpu.memory_space<vmem>>, vector<8x128xf32>,
    %c7_i32 = arith.constant 7 : i32
    %234 = arith.index_cast %c7_i32 : i32 to index
    %c0_148 = arith.constant 0 : index
    %c0_149 = arith.constant 0 : index
    %235 = vector.load %arg11[%234, %c0_148, %c0_149] : memref<8x8x512xf32, #tpu.memory_space<vmem>>, vector<1x8x512xf32>
    %236 = vector.shape_cast %235 : vector<1x8x512xf32> to vector<8x512xf32>
    %c0_150 = arith.constant 0 : index
    %c0_151 = arith.constant 0 : index
    %237 = vector.load %arg12[%c0_150, %c0_151] : memref<8x128xf32, #tpu.memory_space<vmem>>, vector<8x128xf32>
    %238 = arith.truncf %237 : vector<8x128xf32> to vector<8x128xbf16>
    %c0_152 = arith.constant 0 : index
    %c0_153 = arith.constant 0 : index
    %239 = vector.load %arg4[%c0_152, %c0_153] : memref<128x512xbf16, #tpu.memory_space<vmem>>, vector<128x512xbf16>
    %cst_154 = arith.constant dense<0.000000e+00> : vector<8x512xf32>
    %240 = tpu.matmul %238, %239, %cst_154 {dimension_numbers = #tpu.dot_dimension_numbers<[1], [0], [0], [1], [0, 0, 1, 1], [], []>} : vector<8x128xbf16>, vector<128x512xbf16>, vector<8x512xf32> -> vector<8x512xf32>
    %241 = arith.addf %236, %240 : vector<8x512xf32>
    %242 = vector.extract_strided_slice %241 {offsets = [0, 0], sizes = [8, 384], strides = [1, 1]} : vector<8x512xf32> to vector<8x384xf32>
    %243 = arith.negf %242 : vector<8x384xf32>
    %244 = math.exp %243 : vector<8x384xf32>
    %cst_155 = arith.constant 1.000000e+00 : f32
    %245 = vector.broadcast %cst_155 : f32 to vector<8x384xf32>
    %246 = arith.addf %245, %244 : vector<8x384xf32>
    %247 = arith.divf %245, %246 : vector<8x384xf32>
    %248 = vector.extract_strided_slice %247 {offsets = [0, 0], sizes = [8, 128], strides = [1, 1]} : vector<8x384xf32> to vector<8x128xf32>
    %249 = vector.extract_strided_slice %247 {offsets = [0, 128], sizes = [8, 128], strides = [1, 1]} : vector<8x384xf32> to vector<8x128xf32>
    %250 = vector.extract_strided_slice %247 {offsets = [0, 256], sizes = [8, 128], strides = [1, 1]} : vector<8x384xf32> to vector<8x128xf32>
    %251 = vector.extract_strided_slice %241 {offsets = [0, 384], sizes = [8, 128], strides = [1, 1]} : vector<8x512xf32> to vector<8x128xf32>
    %252 = math.tanh %251 : vector<8x128xf32>
    %c0_156 = arith.constant 0 : index
    %c0_157 = arith.constant 0 : index
    %253 = vector.load %arg13[%c0_156, %c0_157] : memref<8x128xf32, #tpu.memory_space<vmem>>, vector<8x128xf32>
    %254 = arith.mulf %249, %253 : vector<8x128xf32>
    %255 = arith.mulf %248, %252 : vector<8x128xf32>
    %256 = arith.addf %254, %255 : vector<8x128xf32>
    %257 = math.tanh %256 : vector<8x128xf32>
    %258 = arith.mulf %250, %257 : vector<8x128xf32>
    %c0_158 = arith.constant 0 : index
    %c0_159 = arith.constant 0 : index
    %259 = vector.load %arg13[%c0_158, %c0_159] : memref<8x128xf32, #tpu.memory_space<vmem>>, vector<8x128xf32>
    tpu.vector_store %arg13[%c0_158, %c0_159], %256 {strides = array<i32>} : memref<8x128xf32, #tpu.memory_space<vmem>>, vector<8x128xf32>,
    %c0_160 = arith.constant 0 : index
    %c0_161 = arith.constant 0 : index
    %260 = vector.load %arg12[%c0_160, %c0_161] : memref<8x128xf32, #tpu.memory_space<vmem>>, vector<8x128xf32>
    tpu.vector_store %arg12[%c0_160, %c0_161], %258 {strides = array<i32>} : memref<8x128xf32, #tpu.memory_space<vmem>>, vector<8x128xf32>,
    %c0_162 = arith.constant 0 : index
    %c0_163 = arith.constant 0 : index
    %261 = vector.load %arg14[%c0_162, %c0_163] : memref<8x128xf32, #tpu.memory_space<vmem>>, vector<8x128xf32>
    %262 = arith.maximumf %261, %258 : vector<8x128xf32>
    %c0_164 = arith.constant 0 : index
    %c0_165 = arith.constant 0 : index
    %263 = vector.load %arg14[%c0_164, %c0_165] : memref<8x128xf32, #tpu.memory_space<vmem>>, vector<8x128xf32>
    tpu.vector_store %arg14[%c0_164, %c0_165], %262 {strides = array<i32>} : memref<8x128xf32, #tpu.memory_space<vmem>>, vector<8x128xf32>,
    %c8_i32 = arith.constant 8 : i32
    %c0_166 = arith.constant 0 : index
    %c0_167 = arith.constant 0 : index
    %264 = vector.load %arg14[%c0_166, %c0_167] : memref<8x128xf32, #tpu.memory_space<vmem>>, vector<8x128xf32>
    %265 = arith.truncf %264 : vector<8x128xf32> to vector<8x128xbf16>
    %c0_168 = arith.constant 0 : index
    %c0_169 = arith.constant 0 : index
    %266 = vector.load %arg6[%c0_168, %c0_169] : memref<128x128xbf16, #tpu.memory_space<vmem>>, vector<128x128xbf16>
    %cst_170 = arith.constant dense<0.000000e+00> : vector<8x128xf32>
    %267 = tpu.matmul %265, %266, %cst_170 {dimension_numbers = #tpu.dot_dimension_numbers<[1], [0], [0], [1], [0, 0, 1, 1], [], []>} : vector<8x128xbf16>, vector<128x128xbf16>, vector<8x128xf32> -> vector<8x128xf32>
    %c0_171 = arith.constant 0 : index
    %c0_172 = arith.constant 0 : index
    %268 = vector.load %arg7[%c0_171, %c0_172] : memref<1x128xf32, #tpu.memory_space<vmem>>, vector<1x128xf32>
    %269 = vector.broadcast %268 : vector<1x128xf32> to vector<8x128xf32>
    %270 = arith.addf %267, %269 : vector<8x128xf32>
    %cst_173 = arith.constant 0.000000e+00 : f32
    %271 = vector.broadcast %cst_173 : f32 to vector<8x128xf32>
    %272 = arith.maximumf %270, %271 : vector<8x128xf32>
    %273 = arith.truncf %272 : vector<8x128xf32> to vector<8x128xbf16>
    %c0_174 = arith.constant 0 : index
    %c0_175 = arith.constant 0 : index
    %274 = vector.load %arg8[%c0_174, %c0_175] : memref<128x128xbf16, #tpu.memory_space<vmem>>, vector<128x128xbf16>
    %cst_176 = arith.constant dense<0.000000e+00> : vector<8x128xf32>
    %275 = tpu.matmul %273, %274, %cst_176 {dimension_numbers = #tpu.dot_dimension_numbers<[1], [0], [0], [1], [0, 0, 1, 1], [], []>} : vector<8x128xbf16>, vector<128x128xbf16>, vector<8x128xf32> -> vector<8x128xf32>
    %c0_177 = arith.constant 0 : index
    %c0_178 = arith.constant 0 : index
    %276 = vector.load %arg9[%c0_177, %c0_178] : memref<1x128xf32, #tpu.memory_space<vmem>>, vector<1x128xf32>
    %277 = vector.broadcast %276 : vector<1x128xf32> to vector<8x128xf32>
    %278 = arith.addf %275, %277 : vector<8x128xf32>
    %279 = arith.negf %278 : vector<8x128xf32>
    %280 = math.exp %279 : vector<8x128xf32>
    %cst_179 = arith.constant 1.000000e+00 : f32
    %281 = vector.broadcast %cst_179 : f32 to vector<8x128xf32>
    %282 = arith.addf %281, %280 : vector<8x128xf32>
    %283 = arith.divf %281, %282 : vector<8x128xf32>
    %c0_180 = arith.constant 0 : index
    %c0_181 = arith.constant 0 : index
    %284 = vector.load %arg10[%c0_180, %c0_181] : memref<8x128xf32, #tpu.memory_space<vmem>>, vector<8x128xf32>
    tpu.vector_store %arg10[%c0_180, %c0_181], %283 {strides = array<i32>} : memref<8x128xf32, #tpu.memory_space<vmem>>, vector<8x128xf32>,
    return
  }
  func.func @transform_0(%arg0: i32) -> (i32, i32, i32) {
    %c0_i32 = arith.constant 0 : i32
    %c0_i32_0 = arith.constant 0 : i32
    %c0_i32_1 = arith.constant 0 : i32
    return %c0_i32, %arg0, %c0_i32_0 : i32, i32, i32
  }
  func.func @transform_1(%arg0: i32) -> (i32, i32, i32) {
    %c0_i32 = arith.constant 0 : i32
    %c0_i32_0 = arith.constant 0 : i32
    %c0_i32_1 = arith.constant 0 : i32
    return %c0_i32, %arg0, %c0_i32_0 : i32, i32, i32
  }
  func.func @transform_2(%arg0: i32) -> (i32, i32) {
    %c0_i32 = arith.constant 0 : i32
    %c0_i32_0 = arith.constant 0 : i32
    %c0_i32_1 = arith.constant 0 : i32
    return %c0_i32, %c0_i32_0 : i32, i32
  }
  func.func @transform_3(%arg0: i32) -> (i32, i32) {
    %c0_i32 = arith.constant 0 : i32
    %c0_i32_0 = arith.constant 0 : i32
    %c0_i32_1 = arith.constant 0 : i32
    return %c0_i32, %c0_i32_0 : i32, i32
  }
  func.func @transform_4(%arg0: i32) -> (i32, i32) {
    %c0_i32 = arith.constant 0 : i32
    %c0_i32_0 = arith.constant 0 : i32
    %c0_i32_1 = arith.constant 0 : i32
    return %c0_i32, %c0_i32_0 : i32, i32
  }
  func.func @transform_5(%arg0: i32) -> (i32, i32) {
    %c0_i32 = arith.constant 0 : i32
    %c0_i32_0 = arith.constant 0 : i32
    %c0_i32_1 = arith.constant 0 : i32
    return %c0_i32, %c0_i32_0 : i32, i32
  }
  func.func @transform_6(%arg0: i32) -> (i32, i32) {
    %c0_i32 = arith.constant 0 : i32
    %c0_i32_0 = arith.constant 0 : i32
    %c0_i32_1 = arith.constant 0 : i32
    return %c0_i32, %c0_i32_0 : i32, i32
  }
  func.func @transform_7(%arg0: i32) -> (i32, i32) {
    %c0_i32 = arith.constant 0 : i32
    %c0_i32_0 = arith.constant 0 : i32
    %c0_i32_1 = arith.constant 0 : i32
    return %c0_i32, %c0_i32_0 : i32, i32
  }
  func.func @transform_8(%arg0: i32) -> (i32, i32) {
    %c0_i32 = arith.constant 0 : i32
    %c0_i32_0 = arith.constant 0 : i32
    %c0_i32_1 = arith.constant 0 : i32
    return %c0_i32, %c0_i32_0 : i32, i32
  }
  func.func @transform_9(%arg0: i32) -> (i32, i32) {
    %c0_i32 = arith.constant 0 : i32
    %c0_i32_0 = arith.constant 0 : i32
    return %arg0, %c0_i32 : i32, i32
  }
}

</mosaic_0001>

<bundles_post_ra>
// kernel: tpu_custom_call.1
= control target key start
LH: loop header
LB: loop body
LE: loop exit
PB: predicated region body
PF: predicated region fallthrough
CT: control target
= control target key end

     0   :  { %14 = vsyncpa [#allocation7], 0  ;;  %s4911_s0 = inlined_call_operand.hbm [shape: f32[8,8,128], index: 0, kind: input, shape index: {}]   ;;  %s4912_s1 = inlined_call_operand.hbm [shape: s32[8,8,128], index: 1, kind: input, shape index: {}]   ;;  %s4913_s2 = inlined_call_operand.hbm [shape: bf16[128,512], index: 2, kind: input, shape index: {}]   ;;  %s4914_s3 = inlined_call_operand.hbm [shape: bf16[128,512], index: 3, kind: input, shape index: {}]   ;;  %s4915_s4 = inlined_call_operand.vmem [shape: f32[1,512], index: 4, kind: input, shape index: {}]   ;;  %s4916_s5 = inlined_call_operand.hbm [shape: bf16[128,128], index: 5, kind: input, shape index: {}]   ;;  %s4917_s6 = inlined_call_operand.vmem [shape: f32[1,128], index: 6, kind: input, shape index: {}]   ;;  %s4918_s7 = inlined_call_operand.hbm [shape: bf16[128,128], index: 7, kind: input, shape index: {}]   ;;  %s4919_s8 = inlined_call_operand.vmem [shape: f32[1,128], index: 8, kind: input, shape index: {}]   ;;  %s4920_s9 = inlined_call_operand.hbm [shape: f32[8,128], index: 9, kind: output, shape index: {}]  }
   0x1   :  { %15 = vsyncpa [#allocation10], 0 }
   0x2   :  { %16 = vsyncpa [#allocation13], 0 }
   0x3   :  { %17 = vsyncpa [#allocation16], 0 }
   0x4   :  { %18 = vsyncpa [#allocation8], 0  ;;  %s4209_s30 = smov [#allocation9]  }
   0x5   :  { %s36_s10 = sshll.u32 %s4209_s30, 4  ;;  %s37_s10 = int_to_ptr.vmem [resolvable:$true] %s36_s10 }
   0x6   :  { %s4067_s11 = scalar_lea.vmem %s37_s10, 1024  ;;  %p4072_p1 = scmp.lt.s32.totalorder %s37_s10, %s37_s10 }
   0x7   :  { %p4068_p0 = scmp.ne.s32.totalorder %s37_s10, %s4067_s11  ;;  %p4073_p2 = scmp.lt.s32.totalorder %s4067_s11, %s4067_s11 }
   0x9   :  { %p4074_p3 = por %p4073_p2, %p4072_p1 }
   0xb   :  { %p4075_p4 = pnand %p4074_p3, %p4068_p0 }
   0xd   :  { %4078 = shalt.err (!%p4075_p4)
}
   0xe   :  { %s4210_s12 = smov 128   ;;  %s4211_s13 = smov 8  }
   0xf   :  { %42 = dma.hbm_to_vmem [thread:$0]  %s4912_s1, 1024, %s37_s10, [#allocation10], %s4210_s12, %s4210_s12, %s4211_s13  }
  0x10   :  { %s4212_s16 = smov [#allocation12]   ;;  %s4213_s18 = smov [#allocation6]  }
  0x11   :  { %s60_s17 = sshll.u32 %s4212_s16, 4  ;;  %s24_s19 = sshll.u32 %s4213_s18, 4  ;;  %s61_s17 = int_to_ptr.vmem [resolvable:$true] %s60_s17  ;;  %s25_s19 = int_to_ptr.vmem [resolvable:$true] %s24_s19 }
  0x12   :  { %s4087_s20 = scalar_lea.vmem %s61_s17, 4096  ;;  %p4092_p6 = scmp.lt.s32.totalorder %s61_s17, %s61_s17 }
  0x13   :  { %p4088_p5 = scmp.ne.s32.totalorder %s61_s17, %s4087_s20  ;;  %p4093_p7 = scmp.lt.s32.totalorder %s4087_s20, %s4087_s20 }
  0x15   :  { %p4094_p8 = por %p4093_p7, %p4092_p6 }
  0x17   :  { %p4095_p9 = pnand %p4094_p8, %p4088_p5 }
  0x19   :  { %4098 = shalt.err (!%p4095_p9)
}
  0x1a   :  { %s4214_s21 = smov 256   ;;  %s4215_s22 = smov 16  }
  0x1b   :  { %66 = dma.hbm_to_vmem [thread:$0]  %s4914_s3, 4096, %s61_s17, [#allocation13], %s4214_s21, %s4214_s21, %s4215_s22  }
  0x1c   :  { %s4107_s1 = scalar_lea.vmem %s25_s19, 1024  ;;  %p4112_p11 = scmp.lt.s32.totalorder %s25_s19, %s25_s19 }
  0x1d   :  { %p4108_p10 = scmp.ne.s32.totalorder %s25_s19, %s4107_s1  ;;  %p4113_p12 = scmp.lt.s32.totalorder %s4107_s1, %s4107_s1 }
  0x1f   :  { %p4114_p13 = por %p4113_p12, %p4112_p11 }
  0x21   :  { %p4115_p0 = pnand %p4114_p13, %p4108_p10 }
  0x23   :  { %4118 = shalt.err (!%p4115_p0)
}
  0x24   :  { %30 = dma.hbm_to_vmem [thread:$0]  %s4911_s0, 1024, %s25_s19, [#allocation7], %s4210_s12, %s4210_s12, %s4211_s13  }
  0x25   :  { %s4216_s27 = smov [#allocation11]   ;;  %s4217_s29 = smov [#allocation14]  }
  0x26   :  { %s48_s28 = sshll.u32 %s4216_s27, 4  ;;  %s74_s30 = sshll.u32 %s4217_s29, 4  ;;  %s49_s28 = int_to_ptr.vmem [resolvable:$true] %s48_s28  ;;  %s75_s30 = int_to_ptr.vmem [resolvable:$true] %s74_s30 }
  0x27   :  { %s4127_s10 = scalar_lea.vmem %s49_s28, 4096  ;;  %p4132_p2 = scmp.lt.s32.totalorder %s49_s28, %s49_s28 }
  0x28   :  { %p4128_p1 = scmp.ne.s32.totalorder %s49_s28, %s4127_s10  ;;  %p4133_p3 = scmp.lt.s32.totalorder %s4127_s10, %s4127_s10 }
  0x2a   :  { %p4134_p4 = por %p4133_p3, %p4132_p2 }
  0x2c   :  { %p4135_p5 = pnand %p4134_p4, %p4128_p1 }
  0x2e   :  { %4138 = shalt.err (!%p4135_p5)
}
  0x2f   :  { %54 = dma.hbm_to_vmem [thread:$0]  %s4913_s2, 4096, %s49_s28, [#allocation10], %s4214_s21, %s4214_s21, %s4215_s22  }
  0x30   :  { %s4147_s14 = scalar_lea.vmem %s75_s30, 1024  ;;  %p4152_p7 = scmp.lt.s32.totalorder %s75_s30, %s75_s30 }
  0x31   :  { %p4148_p6 = scmp.ne.s32.totalorder %s75_s30, %s4147_s14  ;;  %p4153_p8 = scmp.lt.s32.totalorder %s4147_s14, %s4147_s14 }
  0x33   :  { %p4154_p9 = por %p4153_p8, %p4152_p7 }
  0x35   :  { %p4155_p10 = pnand %p4154_p9, %p4148_p6 }
  0x37   :  { %4158 = shalt.err (!%p4155_p10)
}
  0x38   :  { %s4218_s0 = smov 64   ;;  %s4219_s12 = smov 4  }
  0x39   :  { %80 = dma.hbm_to_vmem [thread:$0]  %s4916_s5, 1024, %s75_s30, [#allocation13], %s4218_s0, %s4218_s0, %s4219_s12  }
  0x3a   :  { %s4220_s16 = smov [#allocation15]  }
  0x3b   :  { %s88_s17 = sshll.u32 %s4220_s16, 4  ;;  %s89_s17 = int_to_ptr.vmem [resolvable:$true] %s88_s17 }
  0x3c   :  { %s4167_s18 = scalar_lea.vmem %s89_s17, 1024  ;;  %p4172_p12 = scmp.lt.s32.totalorder %s89_s17, %s89_s17 }
  0x3d   :  { %p4168_p11 = scmp.ne.s32.totalorder %s89_s17, %s4167_s18  ;;  %p4173_p13 = scmp.lt.s32.totalorder %s4167_s18, %s4167_s18 }
  0x3f   :  { %p4174_p0 = por %p4173_p13, %p4172_p12 }
  0x41   :  { %p4175_p1 = pnand %p4174_p0, %p4168_p11 }
  0x43   :  { %4178 = shalt.err (!%p4175_p1)
}
  0x44   :  { %94 = dma.hbm_to_vmem [thread:$0]  %s4918_s7, 1024, %s89_s17, [#allocation16], %s4218_s0, %s4218_s0, %s4219_s12  }
  0x45   :  { %4199 = dma.done.wait [#allocation7], 1024  }
  0x46   :  { %4200 = vsyncadd [#allocation7], 4294966272 }
  0x47   :  { %4201 = dma.done.wait [#allocation10], 5120  }
  0x48   :  { %4202 = vsyncadd [#allocation10], 4294962176 }
  0x49   :  { %4203 = dma.done.wait [#allocation13], 5120  }
  0x4a   :  { %4204 = vsyncadd [#allocation13], 4294962176 }
  0x4b   :  { %4205 = dma.done.wait [#allocation16], 1024  }
  0x4c   :  { %4206 = vsyncadd [#allocation16], 4294966272  ;;  %v4923_v0 = vmov 0   ;;  %v3755_v1 = vld [vmem:[#allocation11 + $0xe4] ss:$16 sps:$4 sm:$0xff]   ;;  %v117_v28 = vld [vmem:[#allocation9 + $0x8] sm:$0xff] }
  0x4d   :  { %422 = vmatprep.mubr.bf16.mxu0 %v4923_v0  ;;  %495 = vmatprep.mubr.bf16.mxu1 %v4923_v0  ;;  %v3757_v2 = vld [vmem:[#allocation11 + $0xec] ss:$16 sps:$4 sm:$0xff]   ;;  %v3759_v3 = vld [vmem:[#allocation11 + $0xe0] ss:$16 sps:$4 sm:$0xff]   ;;  %v3760_v4 = vld [vmem:[#allocation11 + $0xe8] ss:$16 sps:$4 sm:$0xff]  }
  0x4e   :  { %390 = vmatprep.subr.bf16.mxu0 %v3755_v1  ;;  %463 = vmatprep.subr.bf16.mxu1 %v3757_v2  ;;  %v3761_v5 = vld [vmem:[#allocation11 + $0xc4] ss:$16 sps:$4 sm:$0xff]   ;;  %v3763_v6 = vld [vmem:[#allocation11 + $0xcc] ss:$16 sps:$4 sm:$0xff]   ;;  %v3765_v7 = vld [vmem:[#allocation11 + $0xc0] ss:$16 sps:$4 sm:$0xff]  }
  0x4f   :  { %391 = vmatpush1.bf16.msra.mxu0 %v3759_v3  ;;  %464 = vmatpush1.bf16.msra.mxu1 %v3760_v4  ;;  %v3766_v8 = vld [vmem:[#allocation11 + $0xc8] ss:$16 sps:$4 sm:$0xff]   ;;  %v3767_v9 = vld [vmem:[#allocation11 + $0xa4] ss:$16 sps:$4 sm:$0xff]   ;;  %v3769_v10 = vld [vmem:[#allocation11 + $0xac] ss:$16 sps:$4 sm:$0xff]  }
  0x50   :  { %392 = vmatprep.subr.bf16.mxu0 %v3761_v5  ;;  %465 = vmatprep.subr.bf16.mxu1 %v3763_v6  ;;  %v3771_v11 = vld [vmem:[#allocation11 + $0xa0] ss:$16 sps:$4 sm:$0xff]   ;;  %v3772_v12 = vld [vmem:[#allocation11 + $0xa8] ss:$16 sps:$4 sm:$0xff]   ;;  %v3773_v13 = vld [vmem:[#allocation11 + $0x84] ss:$16 sps:$4 sm:$0xff]  }
  0x51   :  { %v3775_v14 = vld [vmem:[#allocation11 + $0x8c] ss:$16 sps:$4 sm:$0xff]   ;;  %v3777_v15 = vld [vmem:[#allocation11 + $0x80] ss:$16 sps:$4 sm:$0xff]   ;;  %v3778_v16 = vld [vmem:[#allocation11 + $0x88] ss:$16 sps:$4 sm:$0xff]  }
  0x52   :  { %v3779_v17 = vld [vmem:[#allocation11 + $0x64] ss:$16 sps:$4 sm:$0xff]   ;;  %v3781_v18 = vld [vmem:[#allocation11 + $0x6c] ss:$16 sps:$4 sm:$0xff]   ;;  %v3783_v19 = vld [vmem:[#allocation11 + $0x60] ss:$16 sps:$4 sm:$0xff]  }
  0x53   :  { %393 = vmatpush1.bf16.msra.mxu0 %v3765_v7  ;;  %466 = vmatpush1.bf16.msra.mxu1 %v3766_v8  ;;  %v3784_v20 = vld [vmem:[#allocation11 + $0x68] ss:$16 sps:$4 sm:$0xff]   ;;  %v3785_v21 = vld [vmem:[#allocation11 + $0x44] ss:$16 sps:$4 sm:$0xff]   ;;  %v3787_v22 = vld [vmem:[#allocation11 + $0x4c] ss:$16 sps:$4 sm:$0xff]  }
  0x54   :  { %394 = vmatprep.subr.bf16.mxu0 %v3767_v9  ;;  %467 = vmatprep.subr.bf16.mxu1 %v3769_v10  ;;  %v3789_v23 = vld [vmem:[#allocation11 + $0x40] ss:$16 sps:$4 sm:$0xff]   ;;  %v3790_v24 = vld [vmem:[#allocation11 + $0x48] ss:$16 sps:$4 sm:$0xff]   ;;  %v3791_v25 = vld [vmem:[#allocation11 + $0x24] ss:$16 sps:$4 sm:$0xff]  }
  0x55   :  { %v3793_v26 = vld [vmem:[#allocation11 + $0x2c] ss:$16 sps:$4 sm:$0xff]   ;;  %v116_v27 = vld [vmem:[#allocation9] sm:$0xff]  ;;  %vm125_vm1 = vcmp.ge.s32.totalorder %v117_v28, 3006477107  ;;  %v4921_v32 = vmov 0.0  }
  0x56   :  { %vm124_vm0 = vcmp.ge.s32.totalorder %v116_v27, 3006477107  ;;  %v148_v29 = vld [vmem:[#allocation6] sm:$0xff]  ;;  %v149_v30 = vld [vmem:[#allocation6 + $0x8] sm:$0xff]  ;;  %v3342_v34 = vsel %vm125_vm1, 1.0, %v4921_v32  ;;  %v118_v46 = vld [vmem:[#allocation9 + $0x10] sm:$0xff] }
  0x57   :  { %395 = vmatpush1.bf16.msra.mxu0 %v3771_v11  ;;  %468 = vmatpush1.bf16.msra.mxu1 %v3772_v12  ;;  %v3795_v31 = vld [vmem:[#allocation11 + $0x20] ss:$16 sps:$4 sm:$0xff]   ;;  %v3341_v33 = vsel %vm124_vm0, 1.0, %v4921_v32  ;;  %v3796_v35 = vld [vmem:[#allocation11 + $0x28] ss:$16 sps:$4 sm:$0xff]   ;;  %v157_v37 = vmul.f32 %v3342_v34, %v149_v30  ;;  %vm4224_vm8 = vmmov 0  }
  0x58   :  { %396 = vmatprep.subr.bf16.mxu0 %v3773_v13  ;;  %469 = vmatprep.subr.bf16.mxu1 %v3775_v14  ;;  %v156_v36 = vmul.f32 %v3341_v33, %v148_v29  ;;  %v3797_v38 = vld [vmem:[#allocation11 + $0x4] ss:$16 sps:$4 sm:$0xff]   ;;  %v3799_v39 = vld [vmem:[#allocation11 + $0xc] ss:$16 sps:$4 sm:$0xff]   ;;  %v3801_v40 = vld [vmem:[#allocation11] ss:$16 sps:$4 sm:$0xff]  }
  0x59   :  { %v3802_v41 = vld [vmem:[#allocation11 + $0x8] ss:$16 sps:$4 sm:$0xff]   ;;  %v165_v43 = vmul.f32 1.25, %v157_v37  ;;  %v4298_v44 = vld [vmem:[#allocation12 + $0xe4] ss:$16 sps:$4 sm:$0xff]  }
  0x5a   :  { %v164_v42 = vmul.f32 1.25, %v156_v36  ;;  %v4300_v45 = vld [vmem:[#allocation12 + $0xec] ss:$16 sps:$4 sm:$0xff]   ;;  %vm126_vm2 = vcmp.ge.s32.totalorder %v118_v46, 3006477107  ;;  %v150_v48 = vld [vmem:[#allocation6 + $0x10] sm:$0xff] }
  0x5b   :  { %397 = vmatpush1.bf16.msra.mxu0 %v3777_v15  ;;  %470 = vmatpush1.bf16.msra.mxu1 %v3778_v16  ;;  %v119_v47 = vld [vmem:[#allocation9 + $0x18] sm:$0xff]  ;;  %v3343_v50 = vsel %vm126_vm2, 1.0, %v4921_v32  ;;  %v4304_v53 = vld [vmem:[#allocation12 + $0xe0] ss:$16 sps:$4 sm:$0xff]   ;;  %v4308_v57 = vld [vmem:[#allocation12 + $0xc4] ss:$16 sps:$4 sm:$0xff]  }
  0x5c   :  { %398 = vmatprep.subr.bf16.mxu0 %v3779_v17  ;;  %471 = vmatprep.subr.bf16.mxu1 %v3781_v18  ;;  %vm127_vm3 = vcmp.ge.s32.totalorder %v119_v47, 3006477107  ;;  %v151_v49 = vld [vmem:[#allocation6 + $0x18] sm:$0xff]  ;;  %v172_v52 = vpack.c.bf16 %v165_v43, %v164_v42  ;;  %v158_v54 = vmul.f32 %v3343_v50, %v150_v48  ;;  %v4314_v59 = vld [vmem:[#allocation12 + $0xc0] ss:$16 sps:$4 sm:$0xff]   ;;  %v121_v2 = vld [vmem:[#allocation9 + $0x28] sm:$0xff] }
  0x5d   :  { %v3344_v51 = vsel %vm127_vm3, 1.0, %v4921_v32  ;;  %v4306_v56 = vld [vmem:[#allocation12 + $0xe8] ss:$16 sps:$4 sm:$0xff]   ;;  %v4312_v58 = vld [vmem:[#allocation12 + $0xcc] ss:$16 sps:$4 sm:$0xff]   ;;  %v120_v1 = vld [vmem:[#allocation9 + $0x20] sm:$0xff] }
  0x5e   :  { %v159_v55 = vmul.f32 %v3344_v51, %v151_v49  ;;  %v4316_v60 = vld [vmem:[#allocation12 + $0xc8] ss:$16 sps:$4 sm:$0xff]   ;;  %v166_v61 = vmul.f32 1.25, %v158_v54  ;;  %v4318_v63 = vld [vmem:[#allocation12 + $0xa4] ss:$16 sps:$4 sm:$0xff]   ;;  %v4223_v50 = vmov 0.0|0.0   ;;  %v210_v51 = vlaneseq }
  0x5f   :  { %399 = vmatpush1.bf16.msra.mxu0 %v3783_v19  ;;  %472 = vmatpush1.bf16.msra.mxu1 %v3784_v20  ;;  %vm128_vm4 = vcmp.ge.s32.totalorder %v120_v1, 3006477107  ;;  %vm129_vm5 = vcmp.ge.s32.totalorder %v121_v2, 3006477107  ;;  %v152_v3 = vld [vmem:[#allocation6 + $0x20] sm:$0xff]  ;;  %v153_v4 = vld [vmem:[#allocation6 + $0x28] sm:$0xff] }
  0x60   :  { %400 = vmatprep.subr.bf16.mxu0 %v3785_v21  ;;  %473 = vmatprep.subr.bf16.mxu1 %v3787_v22  ;;  %v167_v62 = vmul.f32 1.25, %v159_v55  ;;  %v4324_v5 = vld [vmem:[#allocation12 + $0xac] ss:$16 sps:$4 sm:$0xff]   ;;  %v3345_v6 = vsel %vm128_vm4, 1.0, %v4921_v32  ;;  %v3346_v7 = vsel %vm129_vm5, 1.0, %v4921_v32  ;;  %v122_v18 = vld [vmem:[#allocation9 + $0x30] sm:$0xff] }
  0x61   :  { %v160_v8 = vmul.f32 %v3345_v6, %v152_v3  ;;  %v4330_v10 = vld [vmem:[#allocation12 + $0xa0] ss:$16 sps:$4 sm:$0xff]   ;;  %v161_v11 = vmul.f32 %v3346_v7, %v153_v4  ;;  %v4334_v12 = vld [vmem:[#allocation12 + $0xa8] ss:$16 sps:$4 sm:$0xff]   ;;  %v4338_v13 = vld [vmem:[#allocation12 + $0x84] ss:$16 sps:$4 sm:$0xff]  }
  0x62   :  { %v173_v9 = vpack.c.bf16 %v167_v62, %v166_v61  ;;  %v4340_v14 = vld [vmem:[#allocation12 + $0x8c] ss:$16 sps:$4 sm:$0xff]   ;;  %v4342_v15 = vld [vmem:[#allocation12 + $0x80] ss:$16 sps:$4 sm:$0xff]   ;;  %v4344_v16 = vld [vmem:[#allocation12 + $0x88] ss:$16 sps:$4 sm:$0xff]  }
  0x63   :  { %401 = vmatpush1.bf16.msra.mxu0 %v3789_v23  ;;  %474 = vmatpush1.bf16.msra.mxu1 %v3790_v24  ;;  %v168_v17 = vmul.f32 1.25, %v160_v8  ;;  %v123_v19 = vld [vmem:[#allocation9 + $0x38] sm:$0xff]  ;;  %v169_v20 = vmul.f32 1.25, %v161_v11  ;;  %v4346_v21 = vld [vmem:[#allocation12 + $0x64] ss:$16 sps:$4 sm:$0xff]  }
  0x64   :  { %402 = vmatprep.subr.bf16.mxu0 %v3791_v25  ;;  %475 = vmatprep.subr.bf16.mxu1 %v3793_v26  ;;  %vm130_vm6 = vcmp.ge.s32.totalorder %v122_v18, 3006477107  ;;  %vm131_vm7 = vcmp.ge.s32.totalorder %v123_v19, 3006477107  ;;  %v154_v22 = vld [vmem:[#allocation6 + $0x30] sm:$0xff]  ;;  %v155_v25 = vld [vmem:[#allocation6 + $0x38] sm:$0xff] }
  0x65   :  { %v3347_v23 = vsel %vm130_vm6, 1.0, %v4921_v32  ;;  %v3348_v24 = vsel %vm131_vm7, 1.0, %v4921_v32  ;;  %v4354_v26 = vld [vmem:[#allocation12 + $0x6c] ss:$16 sps:$4 sm:$0xff]   ;;  %v174_v27 = vpack.c.bf16 %v169_v20, %v168_v17  ;;  %v4360_v30 = vld [vmem:[#allocation12 + $0x60] ss:$16 sps:$4 sm:$0xff]  }
  0x66   :  { %v162_v28 = vmul.f32 %v3347_v23, %v154_v22  ;;  %v163_v29 = vmul.f32 %v3348_v24, %v155_v25  ;;  %v4366_v33 = vld [vmem:[#allocation12 + $0x44] ss:$16 sps:$4 sm:$0xff]   ;;  %v4368_v34 = vld [vmem:[#allocation12 + $0x4c] ss:$16 sps:$4 sm:$0xff]   ;;  %v4372_v36 = vld [vmem:[#allocation12 + $0x48] ss:$16 sps:$4 sm:$0xff]  }
  0x67   :  { %403 = vmatpush1.bf16.msra.mxu0 %v3795_v31  ;;  %476 = vmatpush1.bf16.msra.mxu1 %v3796_v35  ;;  %v4362_v31 = vld [vmem:[#allocation12 + $0x68] ss:$16 sps:$4 sm:$0xff]   ;;  %v4370_v35 = vld [vmem:[#allocation12 + $0x40] ss:$16 sps:$4 sm:$0xff]   ;;  %v4388_v46 = vld [vmem:[#allocation12 + $0x4] ss:$16 sps:$4 sm:$0xff]  }
  0x68   :  { %404 = vmatprep.subr.bf16.mxu0 %v3797_v38  ;;  %477 = vmatprep.subr.bf16.mxu1 %v3799_v39  ;;  %v170_v37 = vmul.f32 1.25, %v162_v28  ;;  %v171_v38 = vmul.f32 1.25, %v163_v29  ;;  %v4374_v39 = vld [vmem:[#allocation12 + $0x24] ss:$16 sps:$4 sm:$0xff]   ;;  %v4386_v42 = vld [vmem:[#allocation12 + $0x28] ss:$16 sps:$4 sm:$0xff]  }
  0x69   :  { %v4390_v47 = vld [vmem:[#allocation12 + $0xc] ss:$16 sps:$4 sm:$0xff]   ;;  %v4396_v48 = vld [vmem:[#allocation12] ss:$16 sps:$4 sm:$0xff]   ;;  %v4398_v49 = vld [vmem:[#allocation12 + $0x8] ss:$16 sps:$4 sm:$0xff]  }
  0x6a   :  { %v175_v43 = vpack.c.bf16 %v171_v38, %v170_v37  ;;  %v208_v62 = vld [vmem:[%s4915_s4] sm:$0xf] }
  0x6b   :  { %405 = vmatpush1.bf16.msra.mxu0 %v3801_v40  ;;  %478 = vmatpush1.bf16.msra.mxu1 %v3802_v41  ;;  %v4376_v40 = vld [vmem:[#allocation12 + $0x2c] ss:$16 sps:$4 sm:$0xff]   ;;  %v4384_v41 = vld [vmem:[#allocation12 + $0x20] ss:$16 sps:$4 sm:$0xff]  }
  0x6c   :  { %769 = vmatprep.subr.bf16.mxu0 %v4298_v44  ;;  %810 = vmatprep.subr.bf16.mxu1 %v4300_v45 }
  0x6e   :  { %423 = vmatmul.mubr.bf16.vlgmr.msra.gmra.mxu0 %v172_v52  ;;  %496 = vmatmul.mubr.bf16.vlgmr.msra.gmra.mxu1 %v172_v52  ;;  %v211_v52 = vshrl.u32 %v210_v51, 7 }
  0x6f   :  { %770 = vmatpush1.bf16.msra.mxu0 %v4304_v53  ;;  %811 = vmatpush1.bf16.msra.mxu1 %v4306_v56 }
  0x70   :  { %771 = vmatprep.subr.bf16.mxu0 %v4308_v57  ;;  %812 = vmatprep.subr.bf16.mxu1 %v4312_v58  ;;  %v220_v54 = vsub.s32 2, %v211_v52  ;;  %v212_v55 = vsub.s32 0, %v211_v52  ;;  %v224_v61 = vsub.s32 3, %v211_v52  ;;  %v216_v4 = vsub.s32 1, %v211_v52 }
  0x71   :  { %432 = vmatprep.mubr.bf16.mxu0 %v4923_v0  ;;  %505 = vmatprep.mubr.bf16.mxu1 %v4923_v0 }
  0x72   :  { %v4451_v3 = vrot.slane %v208_v62, %v220_v54  ;;  %v4457_v7 = vrot.slane %v208_v62, %v224_v61  ;;  %v217_v11 = vrot.slane %v208_v62, %v216_v4 }
  0x73   :  { %772 = vmatpush1.bf16.msra.mxu0 %v4314_v59  ;;  %813 = vmatpush1.bf16.msra.mxu1 %v4316_v60 }
  0x74   :  { %773 = vmatprep.subr.bf16.mxu0 %v4318_v63  ;;  %814 = vmatprep.subr.bf16.mxu1 %v4324_v5 }
  0x76   :  { %433 = vmatmul.mubr.bf16.gmra.mxu0 %v173_v9  ;;  %506 = vmatmul.mubr.bf16.gmra.mxu1 %v173_v9 }
  0x77   :  { %774 = vmatpush1.bf16.msra.mxu0 %v4330_v10  ;;  %815 = vmatpush1.bf16.msra.mxu1 %v4334_v12 }
  0x78   :  { %775 = vmatprep.subr.bf16.mxu0 %v4338_v13  ;;  %816 = vmatprep.subr.bf16.mxu1 %v4340_v14 }
  0x79   :  { %442 = vmatprep.mubr.bf16.mxu0 %v4923_v0  ;;  %515 = vmatprep.mubr.bf16.mxu1 %v4923_v0 }
  0x7b   :  { %776 = vmatpush1.bf16.msra.mxu0 %v4342_v15  ;;  %817 = vmatpush1.bf16.msra.mxu1 %v4344_v16 }
  0x7c   :  { %777 = vmatprep.subr.bf16.mxu0 %v4346_v21  ;;  %818 = vmatprep.subr.bf16.mxu1 %v4354_v26 }
  0x7e   :  { %443 = vmatmul.mubr.bf16.gmra.mxu0 %v174_v27  ;;  %516 = vmatmul.mubr.bf16.gmra.mxu1 %v174_v27 }
  0x7f   :  { %778 = vmatpush1.bf16.msra.mxu0 %v4360_v30  ;;  %819 = vmatpush1.bf16.msra.mxu1 %v4362_v31 }
  0x80   :  { %779 = vmatprep.subr.bf16.mxu0 %v4366_v33  ;;  %820 = vmatprep.subr.bf16.mxu1 %v4368_v34 }
  0x81   :  { %452 = vmatprep.mubr.bf16.mxu0 %v4923_v0  ;;  %525 = vmatprep.mubr.bf16.mxu1 %v4923_v0 }
  0x83   :  { %780 = vmatpush1.bf16.msra.mxu0 %v4370_v35  ;;  %821 = vmatpush1.bf16.msra.mxu1 %v4372_v36 }
  0x84   :  { %781 = vmatprep.subr.bf16.mxu0 %v4374_v39  ;;  %822 = vmatprep.subr.bf16.mxu1 %v4376_v40 }
  0x86   :  { %453 = vmatmul.mubr.bf16.gmra.mxu0 %v175_v43  ;;  %526 = vmatmul.mubr.bf16.gmra.mxu1 %v175_v43 }
  0x87   :  { %782 = vmatpush1.bf16.msra.mxu0 %v4384_v41  ;;  %823 = vmatpush1.bf16.msra.mxu1 %v4386_v42 }
  0x88   :  { %783 = vmatprep.subr.bf16.mxu0 %v4388_v46  ;;  %824 = vmatprep.subr.bf16.mxu1 %v4390_v47 }
  0x89   :  { %801 = vmatprep.mubr.bf16.mxu0 %v4923_v0  ;;  %842 = vmatprep.mubr.bf16.mxu1 %v4923_v0 }
  0x8b   :  { %784 = vmatpush1.bf16.msra.mxu0 %v4396_v48  ;;  %825 = vmatpush1.bf16.msra.mxu1 %v4398_v49 }
  0x8c   :  { %1084 = vmatprep.subr.bf16.mxu0 %v4298_v44  ;;  %1125 = vmatprep.subr.bf16.mxu1 %v4300_v45 }
  0x8e   :  { %802 = vmatmul.mubr.bf16.vlgmr.msra.gmra.mxu0 %v4223_v50  ;;  %843 = vmatmul.mubr.bf16.vlgmr.msra.gmra.mxu1 %v4223_v50 }
  0x8f   :  { %1085 = vmatpush1.bf16.msra.mxu0 %v4304_v53  ;;  %1126 = vmatpush1.bf16.msra.mxu1 %v4306_v56 }
  0x90   :  { %1086 = vmatprep.subr.bf16.mxu0 %v4308_v57  ;;  %1127 = vmatprep.subr.bf16.mxu1 %v4312_v58 }
  0x91   :  { %1116 = vmatprep.mubr.bf16.mxu0 %v4923_v0  ;;  %1157 = vmatprep.mubr.bf16.mxu1 %v4923_v0 }
  0x93   :  { %1087 = vmatpush1.bf16.msra.mxu0 %v4314_v59  ;;  %1128 = vmatpush1.bf16.msra.mxu1 %v4316_v60 }
  0x94   :  { %1088 = vmatprep.subr.bf16.mxu0 %v4318_v63  ;;  %1129 = vmatprep.subr.bf16.mxu1 %v4324_v5 }
  0x97   :  { %1089 = vmatpush1.bf16.msra.mxu0 %v4330_v10  ;;  %1130 = vmatpush1.bf16.msra.mxu1 %v4334_v12 }
  0x98   :  { %1090 = vmatprep.subr.bf16.mxu0 %v4338_v13  ;;  %1131 = vmatprep.subr.bf16.mxu1 %v4340_v14 }
  0x9b   :  { %1091 = vmatpush1.bf16.msra.mxu0 %v4342_v15  ;;  %1132 = vmatpush1.bf16.msra.mxu1 %v4344_v16 }
  0x9c   :  { %1092 = vmatprep.subr.bf16.mxu0 %v4346_v21  ;;  %1133 = vmatprep.subr.bf16.mxu1 %v4354_v26 }
  0x9f   :  { %1093 = vmatpush1.bf16.msra.mxu0 %v4360_v30  ;;  %1134 = vmatpush1.bf16.msra.mxu1 %v4362_v31 }
  0xa0   :  { %1094 = vmatprep.subr.bf16.mxu0 %v4366_v33  ;;  %1135 = vmatprep.subr.bf16.mxu1 %v4368_v34 }
  0xa3   :  { %1095 = vmatpush1.bf16.msra.mxu0 %v4370_v35  ;;  %1136 = vmatpush1.bf16.msra.mxu1 %v4372_v36 }
  0xa4   :  { %1096 = vmatprep.subr.bf16.mxu0 %v4374_v39  ;;  %1137 = vmatprep.subr.bf16.mxu1 %v4376_v40 }
  0xa7   :  { %1097 = vmatpush1.bf16.msra.mxu0 %v4384_v41  ;;  %1138 = vmatpush1.bf16.msra.mxu1 %v4386_v42 }
  0xa8   :  { %1098 = vmatprep.subr.bf16.mxu0 %v4388_v46  ;;  %1139 = vmatprep.subr.bf16.mxu1 %v4390_v47 }
  0xab   :  { %1099 = vmatpush1.bf16.msra.mxu0 %v4396_v48  ;;  %1140 = vmatpush1.bf16.msra.mxu1 %v4398_v49 }
  0xac   :  { %1399 = vmatprep.subr.bf16.mxu0 %v4298_v44  ;;  %1440 = vmatprep.subr.bf16.mxu1 %v4300_v45  ;;  %v213_v45 = vrot.slane %v208_v62, %v212_v55 }
 0x12e   :  { %v4447_v1 = vpop.f32.mrf.mxu0  ;;  %v4449_v2 = vpop.f32.mrf.mxu1 }
 0x130   :  { %v4453_v6 = vpop.f32.mrf.mxu0  ;;  %v4455_v44 = vpop.f32.mrf.mxu1 }
 0x132   :  { %v428_v8 = vpop.f32.mrf.mxu0  ;;  %v501_v9 = vpop.f32.mrf.mxu1 }
 0x133   :  { %v4459_v17 = vadd.f32 %v428_v8, %v213_v45  ;;  %v4462_v18 = vadd.f32 %v501_v9, %v4451_v3 }
 0x134   :  { %v430_v19 = vpop.f32.mrf.mxu0  ;;  %v503_v20 = vpop.f32.mrf.mxu1 }
 0x135   :  { %v4464_v22 = vadd.f32 %v430_v19, %v217_v11  ;;  %v4467_v23 = vadd.f32 %v503_v20, %v4457_v7 }
 0x136   :  { %v434_v24 = vpop.f32.mrf.mxu0  ;;  %v507_v25 = vpop.f32.mrf.mxu1 }
 0x137   :  { %v4469_v27 = vadd.f32 %v434_v24, %v213_v45  ;;  %v4472_v28 = vadd.f32 %v507_v25, %v4451_v3 }
 0x138   :  { %v436_v29 = vpop.f32.mrf.mxu0  ;;  %v509_v37 = vpop.f32.mrf.mxu1 }
 0x139   :  { %v4474_v38 = vadd.f32 %v436_v29, %v217_v11  ;;  %v4477_v43 = vadd.f32 %v509_v37, %v4457_v7 }
 0x13a   :  { %v438_v50 = vpop.f32.mrf.mxu0  ;;  %v511_v51 = vpop.f32.mrf.mxu1 }
 0x13b   :  { %v4479_v52 = vadd.f32 %v438_v50, %v213_v45  ;;  %v4482_v54 = vadd.f32 %v511_v51, %v4451_v3 }
 0x13c   :  { %v440_v55 = vpop.f32.mrf.mxu0  ;;  %v513_v61 = vpop.f32.mrf.mxu1 }
 0x13d   :  { %4925 = vst [vmem:[#allocation23_spill] sm:$0xff] %v4482_v54  ;;  %v4484_v62 = vadd.f32 %v440_v55, %v217_v11  ;;  %v4487_v4 = vadd.f32 %v513_v61, %v4457_v7 }
 0x13e   :  { %v444_v8 = vpop.f32.mrf.mxu0  ;;  %v517_v9 = vpop.f32.mrf.mxu1 }
 0x13f   :  { %4926 = vst [vmem:[#allocation24_spill] sm:$0xff] %v4484_v62  ;;  %4927 = vst [vmem:[#allocation25_spill] sm:$0xff] %v4487_v4  ;;  %v4489_v19 = vadd.f32 %v444_v8, %v213_v45  ;;  %v4492_v20 = vadd.f32 %v517_v9, %v4451_v3 }
 0x140   :  { %v446_v24 = vpop.f32.mrf.mxu0  ;;  %v519_v25 = vpop.f32.mrf.mxu1 }
 0x141   :  { %4928 = vst [vmem:[#allocation26_spill] sm:$0xff] %v4489_v19  ;;  %4929 = vst [vmem:[#allocation27_spill] sm:$0xff] %v4492_v20  ;;  %v4494_v29 = vadd.f32 %v446_v24, %v217_v11  ;;  %v4497_v37 = vadd.f32 %v519_v25, %v4457_v7 }
 0x142   :  { %v448_v50 = vpop.f32.mrf.mxu0  ;;  %v521_v51 = vpop.f32.mrf.mxu1 }
 0x143   :  { %4930 = vst [vmem:[#allocation28_spill] sm:$0xff] %v4494_v29  ;;  %4931 = vst [vmem:[#allocation29_spill] sm:$0xff] %v4497_v37  ;;  %v4499_v55 = vadd.f32 %v448_v50, %v213_v45  ;;  %v4502_v61 = vadd.f32 %v521_v51, %v4451_v3 }
 0x144   :  { %v450_v32 = vpop.f32.mrf.mxu0  ;;  %v523_v8 = vpop.f32.mrf.mxu1 }
 0x145   :  { %4932 = vst [vmem:[#allocation30_spill] sm:$0xff] %v4499_v55  ;;  %4933 = vst [vmem:[#allocation31_spill] sm:$0xff] %v4502_v61  ;;  %v4504_v0 = vadd.f32 %v450_v32, %v217_v11  ;;  %v4507_v9 = vadd.f32 %v523_v8, %v4457_v7 }
 0x146   :  { %v454_v20 = vpop.f32.mrf.mxu0  ;;  %v527_v24 = vpop.f32.mrf.mxu1 }
 0x147   :  { %4934 = vst [vmem:[#allocation32_spill] sm:$0xff] %v4504_v0  ;;  %4935 = vst [vmem:[#allocation33_spill] sm:$0xff] %v4507_v9  ;;  %v4509_v29 = vadd.f32 %v454_v20, %v213_v45  ;;  %v4512_v25 = vadd.f32 %v527_v24, %v4451_v3 }
 0x148   :  { %v456_v37 = vpop.f32.mrf.mxu0  ;;  %v529_v50 = vpop.f32.mrf.mxu1 }
 0x149   :  { %4936 = vst [vmem:[#allocation34_spill] sm:$0xff] %v4509_v29  ;;  %4937 = vst [vmem:[#allocation35_spill] sm:$0xff] %v4512_v25  ;;  %v4514_v55 = vadd.f32 %v456_v37, %v217_v11  ;;  %v4517_v51 = vadd.f32 %v529_v50, %v4457_v7  ;;  %v425_v29 = vadd.f32 %v4447_v1, %v213_v45 }
 0x14a   :  { %v458_v61 = vpop.f32.mrf.mxu0  ;;  %v531_v32 = vpop.f32.mrf.mxu1  ;;  %v427_v50 = vadd.f32 %v4453_v6, %v217_v11 }
 0x14b   :  { %4938 = vst [vmem:[#allocation36_spill] sm:$0xff] %v4514_v55  ;;  %4939 = vst [vmem:[#allocation37_spill] sm:$0xff] %v4517_v51  ;;  %v4519_v0 = vadd.f32 %v458_v61, %v213_v45  ;;  %v4522_v8 = vadd.f32 %v531_v32, %v4451_v3  ;;  %v498_v45 = vadd.f32 %v4449_v2, %v4451_v3 }
 0x14c   :  { %v460_v9 = vpop.f32.mrf.mxu0  ;;  %v533_v20 = vpop.f32.mrf.mxu1 }
 0x14d   :  { %4940 = vst [vmem:[#allocation38_spill] sm:$0xff] %v4519_v0  ;;  %4941 = vst [vmem:[#allocation39_spill] sm:$0xff] %v4522_v8  ;;  %v4525_v24 = vadd.f32 %v460_v9, %v217_v11  ;;  %v4528_v25 = vadd.f32 %v533_v20, %v4457_v7  ;;  %v500_v20 = vadd.f32 %v4455_v44, %v4457_v7 }
 0x14e   :  { %v803_v37 = vpop.f32.mrf.mxu0  ;;  %v844_v55 = vpop.f32.mrf.mxu1 }
 0x14f   :  { %v851_v51 = vadd.f32 %v803_v37, %v425_v29  ;;  %v853_v9 = vadd.f32 %v844_v55, %v498_v45 }
 0x150   :  { %v805_v19 = vpop.f32.mrf.mxu0  ;;  %v846_v61 = vpop.f32.mrf.mxu1 }
 0x151   :  { %v3413_v0 = vmul.f32 -1.442695, %v851_v51  ;;  %v852_v4 = vadd.f32 %v805_v19, %v427_v50  ;;  %v3415_v6 = vmul.f32 -1.442695, %v853_v9  ;;  %v854_v29 = vadd.f32 %v846_v61, %v500_v20 }
 0x152   :  { %v807_v32 = vpop.f32.mrf.mxu0  ;;  %v848_v8 = vpop.f32.mrf.mxu1 }
 0x153   :  { %3927 = vpow2.f32 %v3413_v0  ;;  %v3414_v54 = vmul.f32 -1.442695, %v852_v4  ;;  %v4942_v32 = vmov 0  }
 0x154   :  { %v808_v62 = vpop.f32.mrf.mxu0  ;;  %v849_v1 = vpop.f32.mrf.mxu1 }
 0x155   :  { %3929 = vpow2.f32 %v3414_v54 }
 0x156   :  { %3931 = vpow2.f32 %v3415_v6 }
 0x160   :  { %v3928_v11 = vpop.eup %3927 }
 0x161   :  { %v864_v37 = vadd.f32 1.0, %v3928_v11 }
 0x162   :  { %v3930_v51 = vpop.eup %3929 }
 0x163   :  { %3933 = vrcp.f32 %v864_v37  ;;  %v865_v19 = vadd.f32 1.0, %v3930_v51  ;;  %v3932_v0 = vpop.eup %3931 }
 0x164   :  { %3935 = vtanh.f32 %v854_v29  ;;  %v866_v8 = vadd.f32 1.0, %v3932_v0 }
 0x165   :  { %3937 = vrcp.f32 %v865_v19 }
 0x166   :  { %3939 = vrcp.f32 %v866_v8 }
 0x170   :  { %v3934_v62 = vpop.eup %3933 }
 0x171   :  { %v3936_v54 = vpop.eup %3935 }
 0x172   :  { %v3938_v4 = vpop.eup %3937  ;;  %v876_v3 = vmul.f32 %v3936_v54, %v3934_v62 }
 0x173   :  { %v875_v2 = vmul.f32 0.0, %v3938_v4  ;;  %v3940_v44 = vpop.eup %3939 }
 0x175   :  { %v4535_v55 = vadd.f32 %v876_v3, %v875_v2 }
 0x177   :  { %3941 = vtanh.f32 %v4535_v55 }
 0x184   :  { %v3942_v7 = vpop.eup %3941 }
 0x185   :  { %v4538_v50 = vmul.f32 %v3942_v7, %v3940_v44 }
 0x187   :  { %v891_v61 = vpack.c.bf16 %v4538_v50, %v4538_v50 }
 0x189   :  { %1117 = vmatmul.mubr.bf16.vlgmr.msra.gmra.mxu0 %v891_v61  ;;  %1158 = vmatmul.mubr.bf16.vlgmr.msra.gmra.mxu1 %v891_v61 }
 0x18a   :  { %1400 = vmatpush1.bf16.msra.mxu0 %v4304_v53  ;;  %1441 = vmatpush1.bf16.msra.mxu1 %v4306_v56 }
 0x18b   :  { %1401 = vmatprep.subr.bf16.mxu0 %v4308_v57  ;;  %1442 = vmatprep.subr.bf16.mxu1 %v4312_v58 }
 0x18c   :  { %1431 = vmatprep.mubr.bf16.mxu0 %v4942_v32  ;;  %1472 = vmatprep.mubr.bf16.mxu1 %v4942_v32 }
 0x18e   :  { %1402 = vmatpush1.bf16.msra.mxu0 %v4314_v59  ;;  %1443 = vmatpush1.bf16.msra.mxu1 %v4316_v60 }
 0x18f   :  { %1403 = vmatprep.subr.bf16.mxu0 %v4318_v63  ;;  %1444 = vmatprep.subr.bf16.mxu1 %v4324_v5 }
 0x192   :  { %1404 = vmatpush1.bf16.msra.mxu0 %v4330_v10  ;;  %1445 = vmatpush1.bf16.msra.mxu1 %v4334_v12 }
 0x193   :  { %1405 = vmatprep.subr.bf16.mxu0 %v4338_v13  ;;  %1446 = vmatprep.subr.bf16.mxu1 %v4340_v14 }
 0x196   :  { %1406 = vmatpush1.bf16.msra.mxu0 %v4342_v15  ;;  %1447 = vmatpush1.bf16.msra.mxu1 %v4344_v16 }
 0x197   :  { %1407 = vmatprep.subr.bf16.mxu0 %v4346_v21  ;;  %1448 = vmatprep.subr.bf16.mxu1 %v4354_v26 }
 0x19a   :  { %1408 = vmatpush1.bf16.msra.mxu0 %v4360_v30  ;;  %1449 = vmatpush1.bf16.msra.mxu1 %v4362_v31 }
 0x19b   :  { %1409 = vmatprep.subr.bf16.mxu0 %v4366_v33  ;;  %1450 = vmatprep.subr.bf16.mxu1 %v4368_v34 }
 0x19e   :  { %1410 = vmatpush1.bf16.msra.mxu0 %v4370_v35  ;;  %1451 = vmatpush1.bf16.msra.mxu1 %v4372_v36 }
 0x19f   :  { %1411 = vmatprep.subr.bf16.mxu0 %v4374_v39  ;;  %1452 = vmatprep.subr.bf16.mxu1 %v4376_v40 }
 0x1a2   :  { %1412 = vmatpush1.bf16.msra.mxu0 %v4384_v41  ;;  %1453 = vmatpush1.bf16.msra.mxu1 %v4386_v42 }
 0x1a3   :  { %1413 = vmatprep.subr.bf16.mxu0 %v4388_v46  ;;  %1454 = vmatprep.subr.bf16.mxu1 %v4390_v47 }
 0x1a6   :  { %1414 = vmatpush1.bf16.msra.mxu0 %v4396_v48  ;;  %1455 = vmatpush1.bf16.msra.mxu1 %v4398_v49 }
 0x249   :  { %v1118_v53 = vpop.f32.mrf.mxu0  ;;  %v1159_v56 = vpop.f32.mrf.mxu1 }
 0x24a   :  { %v1166_v57 = vadd.f32 %v1118_v53, %v4459_v17  ;;  %v1168_v29 = vadd.f32 %v1159_v56, %v4462_v18  ;;  %v4588_v56 = vld [vmem:[#allocation12 + $0xe4] ss:$16 sps:$4 sm:$0xff]  }
 0x24b   :  { %v1120_v58 = vpop.f32.mrf.mxu0  ;;  %v1161_v59 = vpop.f32.mrf.mxu1  ;;  %1714 = vmatprep.subr.bf16.mxu0 %v4588_v56 }
 0x24c   :  { %v3448_v60 = vmul.f32 -1.442695, %v1166_v57  ;;  %v1167_v1 = vadd.f32 %v1120_v58, %v4464_v22  ;;  %v3450_v37 = vmul.f32 -1.442695, %v1168_v29  ;;  %v1169_v51 = vadd.f32 %v1161_v59, %v4467_v23  ;;  %v4592_v57 = vld [vmem:[#allocation12 + $0xe0] ss:$16 sps:$4 sm:$0xff]  }
 0x24d   :  { %v1122_v45 = vpop.f32.mrf.mxu0  ;;  %v1163_v9 = vpop.f32.mrf.mxu1  ;;  %v4594_v58 = vld [vmem:[#allocation12 + $0xe8] ss:$16 sps:$4 sm:$0xff]   ;;  %v4600_v59 = vld [vmem:[#allocation12 + $0xc4] ss:$16 sps:$4 sm:$0xff]  }
 0x24e   :  { %3943 = vpow2.f32 %v3448_v60  ;;  %v3449_v20 = vmul.f32 -1.442695, %v1167_v1  ;;  %v4602_v60 = vld [vmem:[#allocation12 + $0xcc] ss:$16 sps:$4 sm:$0xff]   ;;  %v4604_v1 = vld [vmem:[#allocation12 + $0xc0] ss:$16 sps:$4 sm:$0xff]  }
 0x24f   :  { %v1123_v6 = vpop.f32.mrf.mxu0  ;;  %v1164_v11 = vpop.f32.mrf.mxu1  ;;  %v4606_v45 = vld [vmem:[#allocation12 + $0xc8] ss:$16 sps:$4 sm:$0xff]  }
 0x250   :  { %3945 = vpow2.f32 %v3449_v20 }
 0x251   :  { %3947 = vpow2.f32 %v3450_v37  ;;  %v4660_v37 = vld [vmem:[#allocation12 + $0xac] ss:$16 sps:$4 sm:$0xff]  }
 0x252   :  { %3949 = vtanh.f32 %v1169_v51  ;;  %v4662_v51 = vld [vmem:[#allocation12 + $0xa0] ss:$16 sps:$4 sm:$0xff]  }
 0x25b   :  { %v3944_v19 = vpop.eup %3943 }
 0x25c   :  { %v1179_v0 = vadd.f32 1.0, %v3944_v19  ;;  %v4664_v19 = vld [vmem:[#allocation12 + $0xa8] ss:$16 sps:$4 sm:$0xff]  }
 0x25d   :  { %v3946_v17 = vpop.eup %3945 }
 0x25e   :  { %3951 = vrcp.f32 %v1179_v0  ;;  %v1180_v62 = vadd.f32 1.0, %v3946_v17  ;;  %v3948_v22 = vpop.eup %3947  ;;  %v4670_v0 = vld [vmem:[#allocation12 + $0x84] ss:$16 sps:$4 sm:$0xff]   ;;  %v4672_v17 = vld [vmem:[#allocation12 + $0x8c] ss:$16 sps:$4 sm:$0xff]  }
 0x25f   :  { %v3950_v54 = vpop.eup %3949  ;;  %v1181_v3 = vadd.f32 1.0, %v3948_v22  ;;  %v4676_v22 = vld [vmem:[#allocation12 + $0x88] ss:$16 sps:$4 sm:$0xff]  }
 0x260   :  { %3953 = vrcp.f32 %v1180_v62  ;;  %v4674_v62 = vld [vmem:[#allocation12 + $0x80] ss:$16 sps:$4 sm:$0xff]  }
 0x261   :  { %3955 = vrcp.f32 %v1181_v3  ;;  %v4692_v3 = vld [vmem:[#allocation12 + $0x44] ss:$16 sps:$4 sm:$0xff]  }
 0x26b   :  { %v3952_v4 = vpop.eup %3951 }
 0x26c   :  { %v1191_v8 = vmul.f32 %v3952_v4, %v3950_v54  ;;  %v4680_v54 = vld [vmem:[#allocation12 + $0x64] ss:$16 sps:$4 sm:$0xff]   ;;  %v4682_v4 = vld [vmem:[#allocation12 + $0x6c] ss:$16 sps:$4 sm:$0xff]  }
 0x26d   :  { %v3954_v2 = vpop.eup %3953 }
 0x26e   :  { %v1190_v44 = vmul.f32 %v3954_v2, %v4535_v55  ;;  %v3956_v23 = vpop.eup %3955  ;;  %v4590_v55 = vld [vmem:[#allocation12 + $0xec] ss:$16 sps:$4 sm:$0xff]   ;;  %v4688_v2 = vld [vmem:[#allocation12 + $0x68] ss:$16 sps:$4 sm:$0xff]  }
 0x26f   :  { %1755 = vmatprep.subr.bf16.mxu1 %v4590_v55 }
 0x270   :  { %v4579_v18 = vadd.f32 %v1191_v8, %v1190_v44  ;;  %v4686_v8 = vld [vmem:[#allocation12 + $0x60] ss:$16 sps:$4 sm:$0xff]   ;;  %v4694_v44 = vld [vmem:[#allocation12 + $0x4c] ss:$16 sps:$4 sm:$0xff]  }
 0x272   :  { %3957 = vtanh.f32 %v4579_v18 }
 0x27f   :  { %v3958_v7 = vpop.eup %3957 }
 0x280   :  { %v4582_v61 = vmul.f32 %v3958_v7, %v3956_v23  ;;  %v4700_v23 = vld [vmem:[#allocation12 + $0x48] ss:$16 sps:$4 sm:$0xff]   ;;  %v4704_v7 = vld [vmem:[#allocation12 + $0x24] ss:$16 sps:$4 sm:$0xff]  }
 0x282   :  { %v1206_v53 = vpack.c.bf16 %v4582_v61, %v4582_v61  ;;  %v1198_v20 = vmax.f32 %v4538_v50, %v4582_v61  ;;  %v4658_v50 = vld [vmem:[#allocation12 + $0xa4] ss:$16 sps:$4 sm:$0xff]   ;;  %v4706_v61 = vld [vmem:[#allocation12 + $0x2c] ss:$16 sps:$4 sm:$0xff]  }
 0x284   :  { %1432 = vmatmul.mubr.bf16.vlgmr.msra.gmra.mxu0 %v1206_v53  ;;  %1473 = vmatmul.mubr.bf16.vlgmr.msra.gmra.mxu1 %v1206_v53  ;;  %v4710_v53 = vld [vmem:[#allocation12 + $0x20] ss:$16 sps:$4 sm:$0xff]  }
 0x285   :  { %1746 = vmatprep.mubr.bf16.mxu0 %v4942_v32  ;;  %1787 = vmatprep.mubr.bf16.mxu1 %v4942_v32 }
 0x286   :  { %1715 = vmatpush1.bf16.msra.mxu0 %v4592_v57  ;;  %1756 = vmatpush1.bf16.msra.mxu1 %v4594_v58 }
 0x287   :  { %1716 = vmatprep.subr.bf16.mxu0 %v4600_v59  ;;  %1757 = vmatprep.subr.bf16.mxu1 %v4602_v60 }
 0x28a   :  { %1717 = vmatpush1.bf16.msra.mxu0 %v4604_v1  ;;  %1758 = vmatpush1.bf16.msra.mxu1 %v4606_v45 }
 0x28b   :  { %1718 = vmatprep.subr.bf16.mxu0 %v4318_v63  ;;  %1759 = vmatprep.subr.bf16.mxu1 %v4324_v5 }
 0x28e   :  { %1719 = vmatpush1.bf16.msra.mxu0 %v4330_v10  ;;  %1760 = vmatpush1.bf16.msra.mxu1 %v4334_v12 }
 0x28f   :  { %1720 = vmatprep.subr.bf16.mxu0 %v4338_v13  ;;  %1761 = vmatprep.subr.bf16.mxu1 %v4340_v14 }
 0x292   :  { %1721 = vmatpush1.bf16.msra.mxu0 %v4342_v15  ;;  %1762 = vmatpush1.bf16.msra.mxu1 %v4344_v16 }
 0x293   :  { %1722 = vmatprep.subr.bf16.mxu0 %v4346_v21  ;;  %1763 = vmatprep.subr.bf16.mxu1 %v4354_v26 }
 0x296   :  { %1723 = vmatpush1.bf16.msra.mxu0 %v4360_v30  ;;  %1764 = vmatpush1.bf16.msra.mxu1 %v4362_v31 }
 0x297   :  { %1724 = vmatprep.subr.bf16.mxu0 %v4366_v33  ;;  %1765 = vmatprep.subr.bf16.mxu1 %v4368_v34 }
 0x29a   :  { %1725 = vmatpush1.bf16.msra.mxu0 %v4370_v35  ;;  %1766 = vmatpush1.bf16.msra.mxu1 %v4372_v36 }
 0x29b   :  { %1726 = vmatprep.subr.bf16.mxu0 %v4374_v39  ;;  %1767 = vmatprep.subr.bf16.mxu1 %v4376_v40 }
 0x29e   :  { %1727 = vmatpush1.bf16.msra.mxu0 %v4384_v41  ;;  %1768 = vmatpush1.bf16.msra.mxu1 %v4386_v42 }
 0x29f   :  { %1728 = vmatprep.subr.bf16.mxu0 %v4388_v46  ;;  %1769 = vmatprep.subr.bf16.mxu1 %v4390_v47 }
 0x2a2   :  { %1729 = vmatpush1.bf16.msra.mxu0 %v4396_v48  ;;  %1770 = vmatpush1.bf16.msra.mxu1 %v4398_v49 }
 0x2a3   :  { %2029 = vmatprep.subr.bf16.mxu0 %v4588_v56  ;;  %2070 = vmatprep.subr.bf16.mxu1 %v4590_v55 }
 0x344   :  { %v1433_v63 = vpop.f32.mrf.mxu0  ;;  %v1474_v5 = vpop.f32.mrf.mxu1 }
 0x345   :  { %v1481_v10 = vadd.f32 %v1433_v63, %v4469_v27  ;;  %v1483_v33 = vadd.f32 %v1474_v5, %v4472_v28  ;;  %v4712_v63 = vld [vmem:[#allocation12 + $0x28] ss:$16 sps:$4 sm:$0xff]   ;;  %v4716_v5 = vld [vmem:[#allocation12 + $0x4] ss:$16 sps:$4 sm:$0xff]  }
 0x346   :  { %v1435_v12 = vpop.f32.mrf.mxu0  ;;  %v1476_v13 = vpop.f32.mrf.mxu1 }
 0x347   :  { %v3483_v14 = vmul.f32 -1.442695, %v1481_v10  ;;  %v1482_v15 = vadd.f32 %v1435_v12, %v4474_v38  ;;  %v3485_v34 = vmul.f32 -1.442695, %v1483_v33  ;;  %v1484_v35 = vadd.f32 %v1476_v13, %v4477_v43  ;;  %v4718_v10 = vld [vmem:[#allocation12 + $0xc] ss:$16 sps:$4 sm:$0xff]  }
 0x348   :  { %v1437_v16 = vpop.f32.mrf.mxu0  ;;  %v1478_v21 = vpop.f32.mrf.mxu1  ;;  %v4722_v12 = vld [vmem:[#allocation12] ss:$16 sps:$4 sm:$0xff]   ;;  %v4724_v13 = vld [vmem:[#allocation12 + $0x8] ss:$16 sps:$4 sm:$0xff]  }
 0x349   :  { %3959 = vpow2.f32 %v3483_v14  ;;  %v3484_v26 = vmul.f32 -1.442695, %v1482_v15 }
 0x34a   :  { %v1438_v30 = vpop.f32.mrf.mxu0  ;;  %v1479_v31 = vpop.f32.mrf.mxu1 }
 0x34b   :  { %3961 = vpow2.f32 %v3484_v26  ;;  %v4943_v31 = vld [vmem:[#allocation24_spill] sm:$0xff] }
 0x34c   :  { %3963 = vpow2.f32 %v3485_v34 }
 0x34d   :  { %3965 = vtanh.f32 %v1484_v35 }
 0x356   :  { %v3960_v36 = vpop.eup %3959 }
 0x357   :  { %v1494_v39 = vadd.f32 1.0, %v3960_v36 }
 0x358   :  { %v3962_v40 = vpop.eup %3961 }
 0x359   :  { %3967 = vrcp.f32 %v1494_v39  ;;  %v1495_v41 = vadd.f32 1.0, %v3962_v40  ;;  %v3964_v42 = vpop.eup %3963 }
 0x35a   :  { %v3966_v46 = vpop.eup %3965  ;;  %v1496_v27 = vadd.f32 1.0, %v3964_v42 }
 0x35b   :  { %3969 = vrcp.f32 %v1495_v41  ;;  %v4944_v41 = vld [vmem:[#allocation23_spill] sm:$0xff] }
 0x35c   :  { %3971 = vrcp.f32 %v1496_v27 }
 0x366   :  { %v3968_v47 = vpop.eup %3967 }
 0x367   :  { %v1506_v48 = vmul.f32 %v3968_v47, %v3966_v46  ;;  %v4945_v47 = vld [vmem:[#allocation25_spill] sm:$0xff] }
 0x368   :  { %v3970_v49 = vpop.eup %3969 }
 0x369   :  { %v1505_v38 = vmul.f32 %v3970_v49, %v4579_v18  ;;  %v3972_v43 = vpop.eup %3971  ;;  %v4698_v18 = vld [vmem:[#allocation12 + $0x40] ss:$16 sps:$4 sm:$0xff]  }
 0x36b   :  { %v4643_v28 = vadd.f32 %v1506_v48, %v1505_v38 }
 0x36d   :  { %3973 = vtanh.f32 %v4643_v28 }
 0x37a   :  { %v3974_v9 = vpop.eup %3973 }
 0x37b   :  { %v1509_v6 = vmul.f32 %v3974_v9, %v3972_v43 }
 0x37d   :  { %v4648_v11 = vmax.f32 %v1198_v20, %v1509_v6  ;;  %v1521_v29 = vpack.c.bf16 %v1509_v6, %v1509_v6 }
 0x37f   :  { %1747 = vmatmul.mubr.bf16.vlgmr.msra.gmra.mxu0 %v1521_v29  ;;  %1788 = vmatmul.mubr.bf16.vlgmr.msra.gmra.mxu1 %v1521_v29 }
 0x380   :  { %2030 = vmatpush1.bf16.msra.mxu0 %v4592_v57  ;;  %2071 = vmatpush1.bf16.msra.mxu1 %v4594_v58 }
 0x381   :  { %2031 = vmatprep.subr.bf16.mxu0 %v4600_v59  ;;  %2072 = vmatprep.subr.bf16.mxu1 %v4602_v60 }
 0x382   :  { %2061 = vmatprep.mubr.bf16.mxu0 %v4942_v32  ;;  %2102 = vmatprep.mubr.bf16.mxu1 %v4942_v32 }
 0x384   :  { %2032 = vmatpush1.bf16.msra.mxu0 %v4604_v1  ;;  %2073 = vmatpush1.bf16.msra.mxu1 %v4606_v45 }
 0x385   :  { %2033 = vmatprep.subr.bf16.mxu0 %v4658_v50  ;;  %2074 = vmatprep.subr.bf16.mxu1 %v4660_v37 }
 0x388   :  { %2034 = vmatpush1.bf16.msra.mxu0 %v4662_v51  ;;  %2075 = vmatpush1.bf16.msra.mxu1 %v4664_v19 }
 0x389   :  { %2035 = vmatprep.subr.bf16.mxu0 %v4670_v0  ;;  %2076 = vmatprep.subr.bf16.mxu1 %v4672_v17 }
 0x38c   :  { %2036 = vmatpush1.bf16.msra.mxu0 %v4674_v62  ;;  %2077 = vmatpush1.bf16.msra.mxu1 %v4676_v22 }
 0x38d   :  { %2037 = vmatprep.subr.bf16.mxu0 %v4680_v54  ;;  %2078 = vmatprep.subr.bf16.mxu1 %v4682_v4 }
 0x390   :  { %2038 = vmatpush1.bf16.msra.mxu0 %v4686_v8  ;;  %2079 = vmatpush1.bf16.msra.mxu1 %v4688_v2 }
 0x391   :  { %2039 = vmatprep.subr.bf16.mxu0 %v4692_v3  ;;  %2080 = vmatprep.subr.bf16.mxu1 %v4694_v44 }
 0x394   :  { %2040 = vmatpush1.bf16.msra.mxu0 %v4698_v18  ;;  %2081 = vmatpush1.bf16.msra.mxu1 %v4700_v23 }
 0x395   :  { %2041 = vmatprep.subr.bf16.mxu0 %v4704_v7  ;;  %2082 = vmatprep.subr.bf16.mxu1 %v4706_v61 }
 0x398   :  { %2042 = vmatpush1.bf16.msra.mxu0 %v4710_v53  ;;  %2083 = vmatpush1.bf16.msra.mxu1 %v4712_v63 }
 0x399   :  { %2043 = vmatprep.subr.bf16.mxu0 %v4716_v5  ;;  %2084 = vmatprep.subr.bf16.mxu1 %v4718_v10 }
 0x39c   :  { %2044 = vmatpush1.bf16.msra.mxu0 %v4722_v12  ;;  %2085 = vmatpush1.bf16.msra.mxu1 %v4724_v13 }
 0x39d   :  { %2344 = vmatprep.subr.bf16.mxu0 %v4588_v56  ;;  %2385 = vmatprep.subr.bf16.mxu1 %v4590_v55 }
 0x43f   :  { %v1748_v14 = vpop.f32.mrf.mxu0  ;;  %v1789_v15 = vpop.f32.mrf.mxu1 }
 0x440   :  { %v1796_v16 = vadd.f32 %v1748_v14, %v4479_v52  ;;  %v1798_v42 = vadd.f32 %v1789_v15, %v4944_v41 }
 0x441   :  { %v1750_v21 = vpop.f32.mrf.mxu0  ;;  %v1791_v26 = vpop.f32.mrf.mxu1 }
 0x442   :  { %v3518_v30 = vmul.f32 -1.442695, %v1796_v16  ;;  %v1797_v33 = vadd.f32 %v1750_v21, %v4943_v31  ;;  %v3520_v46 = vmul.f32 -1.442695, %v1798_v42  ;;  %v1799_v48 = vadd.f32 %v1791_v26, %v4945_v47  ;;  %v4947_v42 = vld [vmem:[#allocation28_spill] sm:$0xff] }
 0x443   :  { %v1752_v34 = vpop.f32.mrf.mxu0  ;;  %v1793_v35 = vpop.f32.mrf.mxu1 }
 0x444   :  { %3975 = vpow2.f32 %v3518_v30  ;;  %v3519_v36 = vmul.f32 -1.442695, %v1797_v33  ;;  %v4946_v35 = vld [vmem:[#allocation26_spill] sm:$0xff] }
 0x445   :  { %v1753_v39 = vpop.f32.mrf.mxu0  ;;  %v1794_v40 = vpop.f32.mrf.mxu1 }
 0x446   :  { %3977 = vpow2.f32 %v3519_v36 }
 0x447   :  { %3979 = vpow2.f32 %v3520_v46 }
 0x448   :  { %3981 = vtanh.f32 %v1799_v48 }
 0x451   :  { %v3976_v49 = vpop.eup %3975 }
 0x452   :  { %v1809_v27 = vadd.f32 1.0, %v3976_v49 }
 0x453   :  { %v3978_v52 = vpop.eup %3977 }
 0x454   :  { %3983 = vrcp.f32 %v1809_v27  ;;  %v1810_v38 = vadd.f32 1.0, %v3978_v52  ;;  %v3980_v43 = vpop.eup %3979 }
 0x455   :  { %v3982_v9 = vpop.eup %3981  ;;  %v1811_v14 = vadd.f32 1.0, %v3980_v43 }
 0x456   :  { %3985 = vrcp.f32 %v1810_v38  ;;  %v4948_v38 = vld [vmem:[#allocation27_spill] sm:$0xff] }
 0x457   :  { %3987 = vrcp.f32 %v1811_v14 }
 0x461   :  { %v3984_v20 = vpop.eup %3983 }
 0x462   :  { %v1821_v6 = vmul.f32 %v3984_v20, %v3982_v9 }
 0x463   :  { %v3986_v29 = vpop.eup %3985 }
 0x464   :  { %v1820_v16 = vmul.f32 %v3986_v29, %v4643_v28  ;;  %v3988_v21 = vpop.eup %3987 }
 0x466   :  { %v4737_v15 = vadd.f32 %v1821_v6, %v1820_v16 }
 0x468   :  { %3989 = vtanh.f32 %v4737_v15 }
 0x475   :  { %v3990_v26 = vpop.eup %3989 }
 0x476   :  { %v4740_v30 = vmul.f32 %v3990_v26, %v3988_v21 }
 0x478   :  { %v1828_v31 = vmax.f32 %v4648_v11, %v4740_v30  ;;  %v1836_v33 = vpack.c.bf16 %v4740_v30, %v4740_v30 }
 0x47a   :  { %2062 = vmatmul.mubr.bf16.vlgmr.msra.gmra.mxu0 %v1836_v33  ;;  %2103 = vmatmul.mubr.bf16.vlgmr.msra.gmra.mxu1 %v1836_v33 }
 0x47b   :  { %2345 = vmatpush1.bf16.msra.mxu0 %v4592_v57  ;;  %2386 = vmatpush1.bf16.msra.mxu1 %v4594_v58 }
 0x47c   :  { %2346 = vmatprep.subr.bf16.mxu0 %v4600_v59  ;;  %2387 = vmatprep.subr.bf16.mxu1 %v4602_v60 }
 0x47d   :  { %2376 = vmatprep.mubr.bf16.mxu0 %v4942_v32  ;;  %2417 = vmatprep.mubr.bf16.mxu1 %v4942_v32 }
 0x47f   :  { %2347 = vmatpush1.bf16.msra.mxu0 %v4604_v1  ;;  %2388 = vmatpush1.bf16.msra.mxu1 %v4606_v45 }
 0x480   :  { %2348 = vmatprep.subr.bf16.mxu0 %v4658_v50  ;;  %2389 = vmatprep.subr.bf16.mxu1 %v4660_v37 }
 0x483   :  { %2349 = vmatpush1.bf16.msra.mxu0 %v4662_v51  ;;  %2390 = vmatpush1.bf16.msra.mxu1 %v4664_v19 }
 0x484   :  { %2350 = vmatprep.subr.bf16.mxu0 %v4670_v0  ;;  %2391 = vmatprep.subr.bf16.mxu1 %v4672_v17 }
 0x487   :  { %2351 = vmatpush1.bf16.msra.mxu0 %v4674_v62  ;;  %2392 = vmatpush1.bf16.msra.mxu1 %v4676_v22 }
 0x488   :  { %2352 = vmatprep.subr.bf16.mxu0 %v4680_v54  ;;  %2393 = vmatprep.subr.bf16.mxu1 %v4682_v4 }
 0x48b   :  { %2353 = vmatpush1.bf16.msra.mxu0 %v4686_v8  ;;  %2394 = vmatpush1.bf16.msra.mxu1 %v4688_v2 }
 0x48c   :  { %2354 = vmatprep.subr.bf16.mxu0 %v4692_v3  ;;  %2395 = vmatprep.subr.bf16.mxu1 %v4694_v44 }
 0x48f   :  { %2355 = vmatpush1.bf16.msra.mxu0 %v4698_v18  ;;  %2396 = vmatpush1.bf16.msra.mxu1 %v4700_v23 }
 0x490   :  { %2356 = vmatprep.subr.bf16.mxu0 %v4704_v7  ;;  %2397 = vmatprep.subr.bf16.mxu1 %v4706_v61 }
 0x493   :  { %2357 = vmatpush1.bf16.msra.mxu0 %v4710_v53  ;;  %2398 = vmatpush1.bf16.msra.mxu1 %v4712_v63 }
 0x494   :  { %2358 = vmatprep.subr.bf16.mxu0 %v4716_v5  ;;  %2399 = vmatprep.subr.bf16.mxu1 %v4718_v10 }
 0x497   :  { %2359 = vmatpush1.bf16.msra.mxu0 %v4722_v12  ;;  %2400 = vmatpush1.bf16.msra.mxu1 %v4724_v13 }
 0x498   :  { %2659 = vmatprep.subr.bf16.mxu0 %v4588_v56  ;;  %2700 = vmatprep.subr.bf16.mxu1 %v4590_v55  ;;  %v4949_v55 = vld [vmem:[#allocation29_spill] sm:$0xff] }
 0x53a   :  { %v2063_v28 = vpop.f32.mrf.mxu0  ;;  %v2104_v34 = vpop.f32.mrf.mxu1 }
 0x53b   :  { %v2111_v36 = vadd.f32 %v2063_v28, %v4946_v35  ;;  %v2113_v56 = vadd.f32 %v2104_v34, %v4948_v38 }
 0x53c   :  { %v2065_v39 = vpop.f32.mrf.mxu0  ;;  %v2106_v40 = vpop.f32.mrf.mxu1 }
 0x53d   :  { %v3553_v41 = vmul.f32 -1.442695, %v2111_v36  ;;  %v2112_v46 = vadd.f32 %v2065_v39, %v4947_v42  ;;  %v3555_v43 = vmul.f32 -1.442695, %v2113_v56  ;;  %v2114_v9 = vadd.f32 %v2106_v40, %v4949_v55 }
 0x53e   :  { %v2067_v47 = vpop.f32.mrf.mxu0  ;;  %v2108_v48 = vpop.f32.mrf.mxu1 }
 0x53f   :  { %3991 = vpow2.f32 %v3553_v41  ;;  %v3554_v49 = vmul.f32 -1.442695, %v2112_v46 }
 0x540   :  { %v2068_v27 = vpop.f32.mrf.mxu0  ;;  %v2109_v52 = vpop.f32.mrf.mxu1 }
 0x541   :  { %3993 = vpow2.f32 %v3554_v49  ;;  %v4952_v52 = vld [vmem:[#allocation31_spill] sm:$0xff] }
 0x542   :  { %3995 = vpow2.f32 %v3555_v43  ;;  %v4953_v43 = vld [vmem:[#allocation33_spill] sm:$0xff] }
 0x543   :  { %3997 = vtanh.f32 %v2114_v9 }
 0x54c   :  { %v3992_v20 = vpop.eup %3991 }
 0x54d   :  { %v2124_v6 = vadd.f32 1.0, %v3992_v20 }
 0x54e   :  { %v3994_v29 = vpop.eup %3993 }
 0x54f   :  { %3999 = vrcp.f32 %v2124_v6  ;;  %v2125_v14 = vadd.f32 1.0, %v3994_v29  ;;  %v3996_v16 = vpop.eup %3995 }
 0x550   :  { %v3998_v21 = vpop.eup %3997  ;;  %v2126_v35 = vadd.f32 1.0, %v3996_v16 }
 0x551   :  { %4001 = vrcp.f32 %v2125_v14 }
 0x552   :  { %4003 = vrcp.f32 %v2126_v35 }
 0x55c   :  { %v4000_v26 = vpop.eup %3999 }
 0x55d   :  { %v2136_v33 = vmul.f32 %v4000_v26, %v3998_v21 }
 0x55e   :  { %v4002_v28 = vpop.eup %4001 }
 0x55f   :  { %v2135_v36 = vmul.f32 %v4002_v28, %v4737_v15  ;;  %v4004_v39 = vpop.eup %4003  ;;  %v4951_v15 = vld [vmem:[#allocation32_spill] sm:$0xff] }
 0x561   :  { %v4785_v34 = vadd.f32 %v2136_v33, %v2135_v36 }
 0x563   :  { %4005 = vtanh.f32 %v4785_v34 }
 0x570   :  { %v4006_v40 = vpop.eup %4005 }
 0x571   :  { %v2139_v41 = vmul.f32 %v4006_v40, %v4004_v39 }
 0x573   :  { %v4791_v42 = vmax.f32 %v1828_v31, %v2139_v41  ;;  %v2151_v46 = vpack.c.bf16 %v2139_v41, %v2139_v41 }
 0x575   :  { %2377 = vmatmul.mubr.bf16.vlgmr.msra.gmra.mxu0 %v2151_v46  ;;  %2418 = vmatmul.mubr.bf16.vlgmr.msra.gmra.mxu1 %v2151_v46 }
 0x576   :  { %2660 = vmatpush1.bf16.msra.mxu0 %v4592_v57  ;;  %2701 = vmatpush1.bf16.msra.mxu1 %v4594_v58 }
 0x577   :  { %2661 = vmatprep.subr.bf16.mxu0 %v4600_v59  ;;  %2702 = vmatprep.subr.bf16.mxu1 %v4602_v60  ;;  %v4950_v59 = vld [vmem:[#allocation30_spill] sm:$0xff] }
 0x578   :  { %2691 = vmatprep.mubr.bf16.mxu0 %v4942_v32  ;;  %2732 = vmatprep.mubr.bf16.mxu1 %v4942_v32 }
 0x57a   :  { %2662 = vmatpush1.bf16.msra.mxu0 %v4604_v1  ;;  %2703 = vmatpush1.bf16.msra.mxu1 %v4606_v45 }
 0x57b   :  { %2663 = vmatprep.subr.bf16.mxu0 %v4658_v50  ;;  %2704 = vmatprep.subr.bf16.mxu1 %v4660_v37 }
 0x57e   :  { %2664 = vmatpush1.bf16.msra.mxu0 %v4662_v51  ;;  %2705 = vmatpush1.bf16.msra.mxu1 %v4664_v19 }
 0x57f   :  { %2665 = vmatprep.subr.bf16.mxu0 %v4670_v0  ;;  %2706 = vmatprep.subr.bf16.mxu1 %v4672_v17 }
 0x582   :  { %2666 = vmatpush1.bf16.msra.mxu0 %v4674_v62  ;;  %2707 = vmatpush1.bf16.msra.mxu1 %v4676_v22 }
 0x583   :  { %2667 = vmatprep.subr.bf16.mxu0 %v4680_v54  ;;  %2708 = vmatprep.subr.bf16.mxu1 %v4682_v4 }
 0x586   :  { %2668 = vmatpush1.bf16.msra.mxu0 %v4686_v8  ;;  %2709 = vmatpush1.bf16.msra.mxu1 %v4688_v2 }
 0x587   :  { %2669 = vmatprep.subr.bf16.mxu0 %v4692_v3  ;;  %2710 = vmatprep.subr.bf16.mxu1 %v4694_v44 }
 0x58a   :  { %2670 = vmatpush1.bf16.msra.mxu0 %v4698_v18  ;;  %2711 = vmatpush1.bf16.msra.mxu1 %v4700_v23 }
 0x58b   :  { %2671 = vmatprep.subr.bf16.mxu0 %v4704_v7  ;;  %2712 = vmatprep.subr.bf16.mxu1 %v4706_v61 }
 0x58e   :  { %2672 = vmatpush1.bf16.msra.mxu0 %v4710_v53  ;;  %2713 = vmatpush1.bf16.msra.mxu1 %v4712_v63 }
 0x58f   :  { %2673 = vmatprep.subr.bf16.mxu0 %v4716_v5  ;;  %2714 = vmatprep.subr.bf16.mxu1 %v4718_v10 }
 0x592   :  { %2674 = vmatpush1.bf16.msra.mxu0 %v4722_v12  ;;  %2715 = vmatpush1.bf16.msra.mxu1 %v4724_v13 }
 0x635   :  { %v2378_v57 = vpop.f32.mrf.mxu0  ;;  %v2419_v58 = vpop.f32.mrf.mxu1 }
 0x636   :  { %v2426_v60 = vadd.f32 %v2378_v57, %v4950_v59  ;;  %v2428_v38 = vadd.f32 %v2419_v58, %v4952_v52  ;;  %v3904_v58 = vld [vmem:[#allocation12 + $0xec] ss:$16 sps:$4 sm:$0xff]   ;;  %v3899_v59 = vld [vmem:[#allocation12 + $0xe0] ss:$16 sps:$4 sm:$0xff]  }
 0x637   :  { %v2380_v1 = vpop.f32.mrf.mxu0  ;;  %v2421_v45 = vpop.f32.mrf.mxu1  ;;  %3015 = vmatprep.subr.bf16.mxu1 %v3904_v58 }
 0x638   :  { %v3588_v11 = vmul.f32 -1.442695, %v2426_v60  ;;  %v2427_v30 = vadd.f32 %v2380_v1, %v4951_v15  ;;  %v3590_v56 = vmul.f32 -1.442695, %v2428_v38  ;;  %v2429_v55 = vadd.f32 %v2421_v45, %v4953_v43  ;;  %v3902_v60 = vld [vmem:[#allocation12 + $0xe8] ss:$16 sps:$4 sm:$0xff]  }
 0x639   :  { %v2382_v31 = vpop.f32.mrf.mxu0  ;;  %v2423_v47 = vpop.f32.mrf.mxu1  ;;  %v3907_v1 = vld [vmem:[#allocation12 + $0xc4] ss:$16 sps:$4 sm:$0xff]   ;;  %v3910_v45 = vld [vmem:[#allocation12 + $0xcc] ss:$16 sps:$4 sm:$0xff]   ;;  %v3908_v15 = vld [vmem:[#allocation12 + $0xc8] ss:$16 sps:$4 sm:$0xff]  }
 0x63a   :  { %4007 = vpow2.f32 %v3588_v11  ;;  %v3589_v48 = vmul.f32 -1.442695, %v2427_v30  ;;  %v3905_v11 = vld [vmem:[#allocation12 + $0xc0] ss:$16 sps:$4 sm:$0xff]  }
 0x63b   :  { %v2383_v49 = vpop.f32.mrf.mxu0  ;;  %v2424_v27 = vpop.f32.mrf.mxu1 }
 0x63c   :  { %4009 = vpow2.f32 %v3589_v48 }
 0x63d   :  { %4011 = vpow2.f32 %v3590_v56 }
 0x63e   :  { %4013 = vtanh.f32 %v2429_v55 }
 0x647   :  { %v4008_v9 = vpop.eup %4007 }
 0x648   :  { %v2439_v20 = vadd.f32 1.0, %v4008_v9 }
 0x649   :  { %v4010_v6 = vpop.eup %4009 }
 0x64a   :  { %4015 = vrcp.f32 %v2439_v20  ;;  %v2440_v29 = vadd.f32 1.0, %v4010_v6  ;;  %v4012_v14 = vpop.eup %4011  ;;  %v3911_v20 = vld [vmem:[#allocation14 + $0x38] sm:$0xff]   ;;  %v3912_v6 = vld [vmem:[#allocation14 + $0x30] sm:$0xff]  }
 0x64b   :  { %v4014_v16 = vpop.eup %4013  ;;  %v2441_v28 = vadd.f32 1.0, %v4012_v14  ;;  %v3914_v14 = vld [vmem:[#allocation14 + $0x20] sm:$0xff]  }
 0x64c   :  { %4017 = vrcp.f32 %v2440_v29  ;;  %v3913_v29 = vld [vmem:[#allocation14 + $0x28] sm:$0xff]  }
 0x64d   :  { %4019 = vrcp.f32 %v2441_v28  ;;  %v3920_v28 = vld [vmem:[#allocation15 + $0x30] sm:$0xff]  }
 0x657   :  { %v4016_v21 = vpop.eup %4015 }
 0x658   :  { %v2451_v26 = vmul.f32 %v4016_v21, %v4014_v16  ;;  %v3916_v16 = vld [vmem:[#allocation14 + $0x10] sm:$0xff]   ;;  %v3917_v21 = vld [vmem:[#allocation14 + $0x8] sm:$0xff]  }
 0x659   :  { %v4018_v33 = vpop.eup %4017 }
 0x65a   :  { %v2450_v35 = vmul.f32 %v4018_v33, %v4785_v34  ;;  %v4020_v39 = vpop.eup %4019  ;;  %v3901_v34 = vld [vmem:[#allocation12 + $0xe4] ss:$16 sps:$4 sm:$0xff]   ;;  %v3919_v33 = vld [vmem:[#allocation15 + $0x38] sm:$0xff]  }
 0x65b   :  { %2974 = vmatprep.subr.bf16.mxu0 %v3901_v34 }
 0x65c   :  { %v4830_v36 = vadd.f32 %v2451_v26, %v2450_v35  ;;  %v3918_v26 = vld [vmem:[#allocation14] sm:$0xff]   ;;  %v3921_v35 = vld [vmem:[#allocation15 + $0x28] sm:$0xff]  }
 0x65e   :  { %4021 = vtanh.f32 %v4830_v36 }
 0x66b   :  { %v4022_v40 = vpop.eup %4021 }
 0x66c   :  { %v4833_v41 = vmul.f32 %v4022_v40, %v4020_v39  ;;  %v3923_v39 = vld [vmem:[#allocation15 + $0x18] sm:$0xff]   ;;  %v3924_v40 = vld [vmem:[#allocation15 + $0x10] sm:$0xff]  }
 0x66e   :  { %v2458_v46 = vmax.f32 %v4791_v42, %v4833_v41  ;;  %v2466_v57 = vpack.c.bf16 %v4833_v41, %v4833_v41  ;;  %v3915_v42 = vld [vmem:[#allocation14 + $0x18] sm:$0xff]  }
 0x670   :  { %2692 = vmatmul.mubr.bf16.vlgmr.msra.gmra.mxu0 %v2466_v57  ;;  %2733 = vmatmul.mubr.bf16.vlgmr.msra.gmra.mxu1 %v2466_v57  ;;  %v4959_v57 = vld [vmem:[#allocation38_spill] sm:$0xff] }
 0x671   :  { %3006 = vmatprep.mubr.bf16.mxu0 %v4942_v32  ;;  %3047 = vmatprep.mubr.bf16.mxu1 %v4942_v32  ;;  %v4954_v32 = vmov 0.0  }
 0x672   :  { %2975 = vmatpush1.bf16.msra.mxu0 %v3899_v59  ;;  %3016 = vmatpush1.bf16.msra.mxu1 %v3902_v60 }
 0x673   :  { %2976 = vmatprep.subr.bf16.mxu0 %v3907_v1  ;;  %3017 = vmatprep.subr.bf16.mxu1 %v3910_v45 }
 0x676   :  { %2977 = vmatpush1.bf16.msra.mxu0 %v3905_v11  ;;  %3018 = vmatpush1.bf16.msra.mxu1 %v3908_v15 }
 0x677   :  { %2978 = vmatprep.subr.bf16.mxu0 %v4658_v50  ;;  %3019 = vmatprep.subr.bf16.mxu1 %v4660_v37 }
 0x67a   :  { %2979 = vmatpush1.bf16.msra.mxu0 %v4662_v51  ;;  %3020 = vmatpush1.bf16.msra.mxu1 %v4664_v19  ;;  %v4955_v51 = vld [vmem:[#allocation34_spill] sm:$0xff] }
 0x67b   :  { %2980 = vmatprep.subr.bf16.mxu0 %v4670_v0  ;;  %3021 = vmatprep.subr.bf16.mxu1 %v4672_v17 }
 0x67e   :  { %2981 = vmatpush1.bf16.msra.mxu0 %v4674_v62  ;;  %3022 = vmatpush1.bf16.msra.mxu1 %v4676_v22  ;;  %v4956_v22 = vld [vmem:[#allocation36_spill] sm:$0xff] }
 0x67f   :  { %2982 = vmatprep.subr.bf16.mxu0 %v4680_v54  ;;  %3023 = vmatprep.subr.bf16.mxu1 %v4682_v4 }
 0x682   :  { %2983 = vmatpush1.bf16.msra.mxu0 %v4686_v8  ;;  %3024 = vmatpush1.bf16.msra.mxu1 %v4688_v2 }
 0x683   :  { %2984 = vmatprep.subr.bf16.mxu0 %v4692_v3  ;;  %3025 = vmatprep.subr.bf16.mxu1 %v4694_v44 }
 0x686   :  { %2985 = vmatpush1.bf16.msra.mxu0 %v4698_v18  ;;  %3026 = vmatpush1.bf16.msra.mxu1 %v4700_v23  ;;  %v4957_v18 = vld [vmem:[#allocation35_spill] sm:$0xff] }
 0x687   :  { %2986 = vmatprep.subr.bf16.mxu0 %v4704_v7  ;;  %3027 = vmatprep.subr.bf16.mxu1 %v4706_v61  ;;  %v4958_v61 = vld [vmem:[#allocation37_spill] sm:$0xff] }
 0x68a   :  { %2987 = vmatpush1.bf16.msra.mxu0 %v4710_v53  ;;  %3028 = vmatpush1.bf16.msra.mxu1 %v4712_v63 }
 0x68b   :  { %2988 = vmatprep.subr.bf16.mxu0 %v4716_v5  ;;  %3029 = vmatprep.subr.bf16.mxu1 %v4718_v10 }
 0x68e   :  { %2989 = vmatpush1.bf16.msra.mxu0 %v4722_v12  ;;  %3030 = vmatpush1.bf16.msra.mxu1 %v4724_v13 }
 0x68f   :  { %3698 = vmatprep.subr.bf16.mxu0 %v4954_v32  ;;  %3718 = vmatprep.subr.bf16.mxu1 %v4954_v32 }
 0x730   :  { %v2693_v50 = vpop.f32.mrf.mxu0  ;;  %v2734_v37 = vpop.f32.mrf.mxu1 }
 0x731   :  { %v2741_v19 = vadd.f32 %v2693_v50, %v4955_v51  ;;  %v2743_v23 = vadd.f32 %v2734_v37, %v4957_v18  ;;  %v4960_v51 = vld [vmem:[#allocation39_spill] sm:$0xff] }
 0x732   :  { %v2695_v0 = vpop.f32.mrf.mxu0  ;;  %v2736_v17 = vpop.f32.mrf.mxu1 }
 0x733   :  { %v3623_v62 = vmul.f32 -1.442695, %v2741_v19  ;;  %v2742_v54 = vadd.f32 %v2695_v0, %v4956_v22  ;;  %v3625_v7 = vmul.f32 -1.442695, %v2743_v23  ;;  %v2744_v53 = vadd.f32 %v2736_v17, %v4958_v61 }
 0x734   :  { %v2697_v4 = vpop.f32.mrf.mxu0  ;;  %v2738_v8 = vpop.f32.mrf.mxu1 }
 0x735   :  { %4023 = vpow2.f32 %v3623_v62  ;;  %v3624_v2 = vmul.f32 -1.442695, %v2742_v54 }
 0x736   :  { %v2698_v3 = vpop.f32.mrf.mxu0  ;;  %v2739_v44 = vpop.f32.mrf.mxu1 }
 0x737   :  { %4025 = vpow2.f32 %v3624_v2 }
 0x738   :  { %4027 = vpow2.f32 %v3625_v7 }
 0x739   :  { %4029 = vtanh.f32 %v2744_v53 }
 0x742   :  { %v4024_v63 = vpop.eup %4023 }
 0x743   :  { %v2754_v5 = vadd.f32 1.0, %v4024_v63 }
 0x744   :  { %v4026_v10 = vpop.eup %4025 }
 0x745   :  { %4031 = vrcp.f32 %v2754_v5  ;;  %v2755_v12 = vadd.f32 1.0, %v4026_v10  ;;  %v4028_v13 = vpop.eup %4027  ;;  %v3925_v10 = vld [vmem:[#allocation15 + $0x8] sm:$0xff]  }
 0x746   :  { %v4030_v30 = vpop.eup %4029  ;;  %v2756_v49 = vadd.f32 1.0, %v4028_v13  ;;  %v3661_v13 = vld [vmem:[%s4917_s6] ss:$0 sm:$0xff]  ;;  %s4225_s6 = smov [#allocation17]  }
 0x747   :  { %4033 = vrcp.f32 %v2755_v12  ;;  %v3926_v12 = vld [vmem:[#allocation15] sm:$0xff]   ;;  %s3329_s23 = sshll.u32 %s4225_s6, 4  ;;  %s3330_s23 = int_to_ptr.vmem [resolvable:$true] %s3329_s23 }
 0x748   :  { %4035 = vrcp.f32 %v2756_v49  ;;  %s4179_s24 = scalar_lea.vmem %s3330_s23, 128  ;;  %p4184_p3 = scmp.lt.s32.totalorder %s3330_s23, %s3330_s23 }
 0x749   :  { %p4180_p2 = scmp.ne.s32.totalorder %s3330_s23, %s4179_s24  ;;  %p4185_p4 = scmp.lt.s32.totalorder %s4179_s24, %s4179_s24 }
 0x74b   :  { %p4186_p5 = por %p4185_p4, %p4184_p3 }
 0x74d   :  { %p4187_p6 = pnand %p4186_p5, %p4180_p2 }
 0x752   :  { %v4032_v31 = vpop.eup %4031 }
 0x753   :  { %v2766_v47 = vmul.f32 %v4032_v31, %v4030_v30 }
 0x754   :  { %v4034_v48 = vpop.eup %4033 }
 0x755   :  { %v2765_v27 = vmul.f32 %v4034_v48, %v4830_v36  ;;  %v4036_v38 = vpop.eup %4035  ;;  %v3922_v36 = vld [vmem:[#allocation15 + $0x20] sm:$0xff]  }
 0x757   :  { %v4872_v52 = vadd.f32 %v2766_v47, %v2765_v27 }
 0x759   :  { %4037 = vtanh.f32 %v4872_v52 }
 0x766   :  { %v4038_v56 = vpop.eup %4037 }
 0x767   :  { %v2769_v43 = vmul.f32 %v4038_v56, %v4036_v38  ;;  %v3670_v38 = vld [vmem:[%s4919_s8] ss:$0 sm:$0xff] }
 0x769   :  { %v2781_v55 = vpack.c.bf16 %v2769_v43, %v2769_v43  ;;  %v4878_v9 = vmax.f32 %v2458_v46, %v2769_v43 }
 0x76b   :  { %3007 = vmatmul.mubr.bf16.vlgmr.msra.gmra.mxu0 %v2781_v55  ;;  %3048 = vmatmul.mubr.bf16.vlgmr.msra.gmra.mxu1 %v2781_v55 }
 0x76c   :  { %3699 = vmatpush3.bf16.msra.mxu0 %v3911_v20  ;;  %3714 = vmatprep.mubr.msk.bf16.mxu0 %vm4224_vm8, %v4954_v32 }
 0x76d   :  { %3700 = vmatprep.subr.bf16.mxu0 %v4954_v32  ;;  %3734 = vmatprep.mubr.msk.bf16.mxu1 %vm4224_vm8, %v4954_v32 }
 0x76e   :  { %3719 = vmatpush3.bf16.msra.mxu1 %v3919_v33 }
 0x76f   :  { %3720 = vmatprep.subr.bf16.mxu1 %v4954_v32 }
 0x770   :  { %3701 = vmatpush3.bf16.msra.mxu0 %v3912_v6 }
 0x771   :  { %3702 = vmatprep.subr.bf16.mxu0 %v4954_v32 }
 0x772   :  { %3721 = vmatpush3.bf16.msra.mxu1 %v3920_v28 }
 0x773   :  { %3722 = vmatprep.subr.bf16.mxu1 %v4954_v32 }
 0x774   :  { %3703 = vmatpush3.bf16.msra.mxu0 %v3913_v29 }
 0x775   :  { %3704 = vmatprep.subr.bf16.mxu0 %v4954_v32 }
 0x776   :  { %3723 = vmatpush3.bf16.msra.mxu1 %v3921_v35 }
 0x777   :  { %3724 = vmatprep.subr.bf16.mxu1 %v4954_v32 }
 0x778   :  { %3705 = vmatpush3.bf16.msra.mxu0 %v3914_v14 }
 0x779   :  { %3706 = vmatprep.subr.bf16.mxu0 %v4954_v32 }
 0x77a   :  { %3725 = vmatpush3.bf16.msra.mxu1 %v3922_v36 }
 0x77b   :  { %3726 = vmatprep.subr.bf16.mxu1 %v4954_v32 }
 0x77c   :  { %3707 = vmatpush3.bf16.msra.mxu0 %v3915_v42 }
 0x77d   :  { %3708 = vmatprep.subr.bf16.mxu0 %v4954_v32 }
 0x77e   :  { %3727 = vmatpush3.bf16.msra.mxu1 %v3923_v39 }
 0x77f   :  { %3728 = vmatprep.subr.bf16.mxu1 %v4954_v32 }
 0x780   :  { %3709 = vmatpush3.bf16.msra.mxu0 %v3916_v16 }
 0x781   :  { %3710 = vmatprep.subr.bf16.mxu0 %v4954_v32 }
 0x782   :  { %3729 = vmatpush3.bf16.msra.mxu1 %v3924_v40 }
 0x783   :  { %3730 = vmatprep.subr.bf16.mxu1 %v4954_v32 }
 0x784   :  { %3711 = vmatpush3.bf16.msra.mxu0 %v3917_v21 }
 0x785   :  { %3712 = vmatprep.subr.bf16.mxu0 %v4954_v32 }
 0x786   :  { %3731 = vmatpush3.bf16.msra.mxu1 %v3925_v10 }
 0x787   :  { %3732 = vmatprep.subr.bf16.mxu1 %v4954_v32 }
 0x788   :  { %3713 = vmatpush3.bf16.msra.mxu0 %v3918_v26 }
 0x78a   :  { %3733 = vmatpush3.bf16.msra.mxu1 %v3926_v12 }
 0x82b   :  { %v3008_v41 = vpop.f32.mrf.mxu0  ;;  %v3049_v46 = vpop.f32.mrf.mxu1 }
 0x82c   :  { %v3056_v34 = vadd.f32 %v3008_v41, %v4959_v57  ;;  %v3058_v19 = vadd.f32 %v3049_v46, %v4960_v51 }
 0x82d   :  { %v3010_v58 = vpop.f32.mrf.mxu0  ;;  %v3051_v59 = vpop.f32.mrf.mxu1 }
 0x82e   :  { %v3658_v60 = vmul.f32 -1.442695, %v3056_v34  ;;  %v3057_v1 = vadd.f32 %v3010_v58, %v4525_v24  ;;  %v3660_v0 = vmul.f32 -1.442695, %v3058_v19  ;;  %v3059_v17 = vadd.f32 %v3051_v59, %v4528_v25 }
 0x82f   :  { %v3012_v45 = vpop.f32.mrf.mxu0  ;;  %v3053_v11 = vpop.f32.mrf.mxu1 }
 0x830   :  { %4039 = vpow2.f32 %v3658_v60  ;;  %v3659_v15 = vmul.f32 -1.442695, %v3057_v1 }
 0x831   :  { %v3013_v50 = vpop.f32.mrf.mxu0  ;;  %v3054_v37 = vpop.f32.mrf.mxu1 }
 0x832   :  { %4041 = vpow2.f32 %v3659_v15 }
 0x833   :  { %4043 = vpow2.f32 %v3660_v0 }
 0x834   :  { %4045 = vtanh.f32 %v3059_v17 }
 0x83d   :  { %v4040_v62 = vpop.eup %4039 }
 0x83e   :  { %v3069_v22 = vadd.f32 1.0, %v4040_v62 }
 0x83f   :  { %v4042_v54 = vpop.eup %4041 }
 0x840   :  { %4047 = vrcp.f32 %v3069_v22  ;;  %v3070_v4 = vadd.f32 1.0, %v4042_v54  ;;  %v4044_v24 = vpop.eup %4043 }
 0x841   :  { %v4046_v8 = vpop.eup %4045  ;;  %v3071_v18 = vadd.f32 1.0, %v4044_v24 }
 0x842   :  { %4049 = vrcp.f32 %v3070_v4 }
 0x843   :  { %4051 = vrcp.f32 %v3071_v18 }
 0x84d   :  { %v4048_v2 = vpop.eup %4047 }
 0x84e   :  { %v3081_v3 = vmul.f32 %v4048_v2, %v4046_v8 }
 0x84f   :  { %v4050_v44 = vpop.eup %4049 }
 0x850   :  { %v3080_v23 = vmul.f32 %v4050_v44, %v4872_v52  ;;  %v4052_v25 = vpop.eup %4051 }
 0x852   :  { %v3082_v7 = vadd.f32 %v3081_v3, %v3080_v23 }
 0x854   :  { %4053 = vtanh.f32 %v3082_v7 }
 0x861   :  { %v4054_v61 = vpop.eup %4053 }
 0x862   :  { %v3084_v53 = vmul.f32 %v4054_v61, %v4052_v25 }
 0x864   :  { %v3088_v63 = vmax.f32 %v4878_v9, %v3084_v53 }
 0x866   :  { %v3091_v5 = vpack.c.bf16 %v3088_v63, %v3088_v63 }
 0x868   :  { %3715 = vmatmul.mubr.bf16.vlgmr.msra.gmra.mxu0 %v3091_v5 }
 0x928   :  { %v3197_v30 = vpop.f32.mrf.mxu0 }
 0x929   :  { %v3198_v31 = vadd.f32 %v3661_v13, %v3197_v30 }
 0x92a   :  { %v3716_v47 = vpop.f32.mrf.mxu0 }
 0x92b   :  { %v3203_v48 = vmax.f32 %v3198_v31, 0.0 }
 0x92c   :  { %v3200_v49 = vpop.f32.mrf.mxu0 }
 0x92d   :  { %v3204_v27 = vpack.c.bf16 %v3203_v48, %v3203_v48 }
 0x92e   :  { %v3717_v52 = vpop.f32.mrf.mxu0 }
 0x92f   :  { %3735 = vmatmul.mubr.bf16.vlgmr.msra.gmra.mxu1 %v3204_v27 }
 0x9ef   :  { %v3310_v56 = vpop.f32.mrf.mxu1 }
 0x9f0   :  { %v3311_v32 = vadd.f32 %v3670_v38, %v3310_v56 }
 0x9f1   :  { %v3736_v43 = vpop.f32.mrf.mxu1 }
 0x9f2   :  { %v3679_v55 = vmul.f32 -1.442695, %v3311_v32 }
 0x9f3   :  { %v3313_v9 = vpop.f32.mrf.mxu1 }
 0x9f4   :  { %4055 = vpow2.f32 %v3679_v55 }
 0x9f5   :  { %v3737_v20 = vpop.f32.mrf.mxu1 }
 0xa01   :  { %v4056_v6 = vpop.eup %4055 }
 0xa02   :  { %v3319_v29 = vadd.f32 1.0, %v4056_v6 }
 0xa04   :  { %4057 = vrcp.f32 %v3319_v29 }
 0xa11   :  { %v4058_v14 = vpop.eup %4057 }
 0xa12   :  { %3322 = vst [vmem:[#allocation17] sm:$0xff] %v4058_v14 }
 0xa13   :  { %4190 = shalt.err (!%p4187_p6)
}
 0xa14   :  { %3332 = dma.vmem_to_hbm [thread:$0]  %s3330_s23, 128, %s4920_s9, [#allocation8]  }
 0xa15   :  { %4207 = dma.done.wait [#allocation8], 128  }
 0xa16   :  { %4208 = vsyncadd [#allocation8], 4294967168 }
 0xa17   :  { %3336 = vsyncpa [#allocation7], 1 }
 0xa18   :  { %3337 = vsyncpa [#allocation10], 1 }
 0xa19   :  { %3338 = vsyncpa [#allocation13], 1 }
 0xa1a   :  { %3339 = vsyncpa [#allocation16], 1 }
 0xa1b   :  { %3340 = vsyncpa [#allocation8], 1 }

</bundles_post_ra>
